<compile_context>
chip_gen: v6e
topology: v6e:2x2x1
jax: 0.10.0
libtpu: 0.0.40
codegen_flags: <defaults>
</compile_context>

<pallas_src>
import jax
import jax.numpy as jnp
from jax.experimental import pallas as pl
from jax.experimental.pallas import tpu as pltpu

IN_FEATURES = 30 * 30 * 3   # 2700
HIDDEN = 128
OUT_FEATURES = 5

N_PAD = 128                 # lane-dense output; real logits are columns [:5]
F32_BYTES = 4


def _round_up(x, m):
    return ((x + m - 1) // m) * m


def mlp_kernel(x_ref, w1_ref, b1_ref, w2_ref, b2_ref, o_ref):
    # x_ref: (TB, 2700)    w1_ref: (2700, 128)  b1_ref: (1, 128)
    # w2_ref: (128, N_PAD) b2_ref: (1, N_PAD)   o_ref: (TB, N_PAD)
    h = jnp.dot(x_ref[...], w1_ref[...], preferred_element_type=jnp.float32)
    h = jnp.maximum(h + b1_ref[...], 0.0)                  # bias + ReLU on the VPU
    out = jnp.dot(h, w2_ref[...], preferred_element_type=jnp.float32)
    o_ref[...] = (out + b2_ref[...]).astype(o_ref.dtype)


def pad_params(w1, b1, w2, b2):
    """One-time padding of the *second-layer* params to lane-friendly shapes.

    w1/b1 stay unpadded (K = 2700 matches the unpadded x columns).
    w2: (128,5) -> (128,128) zero cols,  b2: (1,5) -> (1,128) zero cols.
    The extra columns only produce logits that are sliced off, so the math is
    unchanged.
    """
    w2p = jnp.pad(w2, ((0, 0), (0, N_PAD - OUT_FEATURES)))
    b2p = jnp.pad(b2, ((0, 0), (0, N_PAD - OUT_FEATURES)))
    return w1, b1, w2p, b2p


def _batch_dim_semantics():
    """CORE_PARALLEL on v7x (2 TCs/chip), plain 'parallel' elsewhere."""
    try:
        kind = jax.devices()[0].device_kind.lower()
    except Exception:
        kind = ""
    if "v7" in kind and hasattr(pltpu, "CORE_PARALLEL"):
        return (pltpu.CORE_PARALLEL,)
    return ("parallel",)


def nn_forward(x_nchw, padded_params, *, batch_tile=1024):
    """x_nchw: (B, 3, 30, 30) float32. Returns (B, 5) float32.

    batch_tile=1024: double-buffered x tile ~23 MiB + ~3 MiB resident weights
    + ~1 MiB out tile -- fits v7x's 64 MiB VMEM with room to spare; on
    v5e/v6e (128 MiB physical) it can be raised to 2048.
    """
    w1, b1, w2p, b2p = padded_params

    batch = x_nchw.shape[0]
    x_flat = x_nchw.reshape(batch, -1)   # row-major flatten == torch .view

    # Batch tile: multiple of 8 (sublane), capped at batch_tile.
    tb = min(batch_tile, _round_up(batch, 8))
    grid = (pl.cdiv(batch, tb),)         # last block may be partial

    # Actual VMEM footprint (lane/sublane padded, double-buffered) + margin;
    # never pin the limit at a full TC's physical VMEM.
    k_vmem = _round_up(IN_FEATURES, 128)             # 2816 lanes for the x tile
    k_sub = _round_up(IN_FEATURES, 8)                # 2704 sublanes for w1
    vmem_need = (
        2 * tb * k_vmem * F32_BYTES                  # x tile (double-buffered)
        + 2 * tb * N_PAD * F32_BYTES                 # out tile
        + 2 * k_sub * HIDDEN * F32_BYTES             # w1 (resident)
        + 2 * 8 * HIDDEN * F32_BYTES                 # b1
        + 2 * HIDDEN * N_PAD * F32_BYTES             # w2
        + 2 * 8 * N_PAD * F32_BYTES                  # b2
    )
    vmem_limit = int(vmem_need + (8 << 20))          # headroom for compiler scratch

    # Real (unpadded) traffic / flops: one pass over x, weights, output.
    cost = pl.CostEstimate(
        flops=2 * batch * IN_FEATURES * HIDDEN + 2 * batch * HIDDEN * N_PAD,
        transcendentals=0,
        bytes_accessed=(
            batch * IN_FEATURES                      # x (single pass)
            + IN_FEATURES * HIDDEN + HIDDEN          # w1, b1
            + HIDDEN * N_PAD + N_PAD                 # w2, b2
            + batch * N_PAD                          # out
        ) * F32_BYTES,
    )

    out_padded = pl.pallas_call(
        mlp_kernel,
        out_shape=jax.ShapeDtypeStruct((batch, N_PAD), jnp.float32),
        grid_spec=pltpu.PrefetchScalarGridSpec(
            num_scalar_prefetch=0,
            grid=grid,
            in_specs=[
                # x: tiled over batch; full-extent K (=2700) last dim.
                pl.BlockSpec((tb, IN_FEATURES), lambda i: (i, 0)),
                pl.BlockSpec((IN_FEATURES, HIDDEN), lambda i: (0, 0)),  # w1 resident
                pl.BlockSpec((1, HIDDEN), lambda i: (0, 0)),            # b1 resident
                pl.BlockSpec((HIDDEN, N_PAD), lambda i: (0, 0)),        # w2 resident
                pl.BlockSpec((1, N_PAD), lambda i: (0, 0)),             # b2 resident
            ],
            out_specs=pl.BlockSpec((tb, N_PAD), lambda i: (i, 0)),
        ),
        compiler_params=pltpu.CompilerParams(
            dimension_semantics=_batch_dim_semantics(),
            vmem_limit_bytes=vmem_limit,
        ),
        cost_estimate=cost,
    )(x_flat, w1, b1, w2p, b2p)

    # Strip only the lane padding of the output (batch dim is already exact).
    return out_padded[:, :OUT_FEATURES]


def init_params(key):
    """Deterministic parameter init (PyTorch Linear-style uniform bounds).

    Stored as (in_features, out_features) == transpose of torch's weight.
    """
    k1, k2, k3, k4 = jax.random.split(key, 4)
    bound1 = 1.0 / (IN_FEATURES ** 0.5)
    bound2 = 1.0 / (HIDDEN ** 0.5)
    w1 = jax.random.uniform(k1, (IN_FEATURES, HIDDEN), jnp.float32, -bound1, bound1)
    b1 = jax.random.uniform(k2, (1, HIDDEN), jnp.float32, -bound1, bound1)
    w2 = jax.random.uniform(k3, (HIDDEN, OUT_FEATURES), jnp.float32, -bound2, bound2)
    b2 = jax.random.uniform(k4, (1, OUT_FEATURES), jnp.float32, -bound2, bound2)
    return w1, b1, w2, b2


if __name__ == "__main__":
    key = jax.random.PRNGKey(0)
    kx, kp = jax.random.split(key)

    batch = 2
    x = jax.random.normal(kx, (batch, 3, 30, 30), dtype=jnp.float32)
    w1, b1, w2, b2 = init_params(kp)
    padded_params = pad_params(w1, b1, w2, b2)

    out = nn_forward(x, padded_params)
    out = jax.block_until_ready(out)

    # Pure-JAX reference of the same math (unpadded weights).
    ref = jnp.maximum(x.reshape(batch, -1) @ w1 + b1, 0.0) @ w2 + b2
    assert out.shape == (batch, OUT_FEATURES)
    assert jnp.allclose(out, ref, atol=1e-4, rtol=1e-4)

    print("KERNEL_OK")
</pallas_src>

<mosaic_0001>
module attributes {stable_mosaic.version = 11 : i64} {
  func.func @mlp_kernel(%arg0: i32, %arg1: memref<8x2700xf32, #tpu.memory_space<vmem>>, %arg2: memref<2700x128xf32, #tpu.memory_space<vmem>>, %arg3: memref<1x128xf32, #tpu.memory_space<vmem>>, %arg4: memref<128x128xf32, #tpu.memory_space<vmem>>, %arg5: memref<1x128xf32, #tpu.memory_space<vmem>>, %arg6: memref<8x128xf32, #tpu.memory_space<vmem>>) attributes {dimension_semantics = [#tpu.dimension_semantics<parallel>], iteration_bounds = array<i64: 1>, scalar_prefetch = 0 : i64, scratch_operands = 0 : i64, tpu.core_type = #tpu.core_type<tc>, window_params = [{transform_indices = @transform_0, window_bounds = array<i64: 8, 2700>}, {pipeline_mode = #tpu.pipeline_mode<synchronous>, transform_indices = @transform_1, window_bounds = array<i64: 2700, 128>}, {pipeline_mode = #tpu.pipeline_mode<synchronous>, transform_indices = @transform_2, window_bounds = array<i64: 1, 128>}, {pipeline_mode = #tpu.pipeline_mode<synchronous>, transform_indices = @transform_3, window_bounds = array<i64: 128, 128>}, {pipeline_mode = #tpu.pipeline_mode<synchronous>, transform_indices = @transform_4, window_bounds = array<i64: 1, 128>}, {transform_indices = @transform_5, window_bounds = array<i64: 8, 128>}]} {
    %c0 = arith.constant 0 : index
    %c0_0 = arith.constant 0 : index
    %0 = vector.load %arg1[%c0, %c0_0] : memref<8x2700xf32, #tpu.memory_space<vmem>>, vector<8x2700xf32>
    %c0_1 = arith.constant 0 : index
    %c0_2 = arith.constant 0 : index
    %1 = vector.load %arg2[%c0_1, %c0_2] : memref<2700x128xf32, #tpu.memory_space<vmem>>, vector<2700x128xf32>
    %cst = arith.constant dense<0.000000e+00> : vector<8x128xf32>
    %2 = tpu.matmul %0, %1, %cst {dimension_numbers = #tpu.dot_dimension_numbers<[1], [0], [0], [1], [0, 0, 1, 1], [], []>} : vector<8x2700xf32>, vector<2700x128xf32>, vector<8x128xf32> -> vector<8x128xf32>
    %c0_3 = arith.constant 0 : index
    %c0_4 = arith.constant 0 : index
    %3 = vector.load %arg3[%c0_3, %c0_4] : memref<1x128xf32, #tpu.memory_space<vmem>>, vector<1x128xf32>
    %4 = vector.broadcast %3 : vector<1x128xf32> to vector<8x128xf32>
    %5 = arith.addf %2, %4 : vector<8x128xf32>
    %cst_5 = arith.constant 0.000000e+00 : f32
    %6 = vector.broadcast %cst_5 : f32 to vector<8x128xf32>
    %7 = arith.maximumf %5, %6 : vector<8x128xf32>
    %c0_6 = arith.constant 0 : index
    %c0_7 = arith.constant 0 : index
    %8 = vector.load %arg4[%c0_6, %c0_7] : memref<128x128xf32, #tpu.memory_space<vmem>>, vector<128x128xf32>
    %cst_8 = arith.constant dense<0.000000e+00> : vector<8x128xf32>
    %9 = tpu.matmul %7, %8, %cst_8 {dimension_numbers = #tpu.dot_dimension_numbers<[1], [0], [0], [1], [0, 0, 1, 1], [], []>} : vector<8x128xf32>, vector<128x128xf32>, vector<8x128xf32> -> vector<8x128xf32>
    %c0_9 = arith.constant 0 : index
    %c0_10 = arith.constant 0 : index
    %10 = vector.load %arg5[%c0_9, %c0_10] : memref<1x128xf32, #tpu.memory_space<vmem>>, vector<1x128xf32>
    %11 = vector.broadcast %10 : vector<1x128xf32> to vector<8x128xf32>
    %12 = arith.addf %9, %11 : vector<8x128xf32>
    %c0_11 = arith.constant 0 : index
    %c0_12 = arith.constant 0 : index
    %13 = vector.load %arg6[%c0_11, %c0_12] : memref<8x128xf32, #tpu.memory_space<vmem>>, vector<8x128xf32>
    tpu.vector_store %arg6[%c0_11, %c0_12], %12 {strides = array<i32>} : memref<8x128xf32, #tpu.memory_space<vmem>>, vector<8x128xf32>,
    return
  }
  func.func @transform_0(%arg0: i32) -> (i32, i32) {
    %c0_i32 = arith.constant 0 : i32
    %c0_i32_0 = arith.constant 0 : i32
    return %arg0, %c0_i32 : i32, i32
  }
  func.func @transform_1(%arg0: i32) -> (i32, i32) {
    %c0_i32 = arith.constant 0 : i32
    %c0_i32_0 = arith.constant 0 : i32
    %c0_i32_1 = arith.constant 0 : i32
    return %c0_i32, %c0_i32_0 : i32, i32
  }
  func.func @transform_2(%arg0: i32) -> (i32, i32) {
    %c0_i32 = arith.constant 0 : i32
    %c0_i32_0 = arith.constant 0 : i32
    %c0_i32_1 = arith.constant 0 : i32
    return %c0_i32, %c0_i32_0 : i32, i32
  }
  func.func @transform_3(%arg0: i32) -> (i32, i32) {
    %c0_i32 = arith.constant 0 : i32
    %c0_i32_0 = arith.constant 0 : i32
    %c0_i32_1 = arith.constant 0 : i32
    return %c0_i32, %c0_i32_0 : i32, i32
  }
  func.func @transform_4(%arg0: i32) -> (i32, i32) {
    %c0_i32 = arith.constant 0 : i32
    %c0_i32_0 = arith.constant 0 : i32
    %c0_i32_1 = arith.constant 0 : i32
    return %c0_i32, %c0_i32_0 : i32, i32
  }
  func.func @transform_5(%arg0: i32) -> (i32, i32) {
    %c0_i32 = arith.constant 0 : i32
    %c0_i32_0 = arith.constant 0 : i32
    return %arg0, %c0_i32 : i32, i32
  }
}

</mosaic_0001>

<bundles_post_ra>
// kernel: tpu_custom_call.1
= control target key start
LH: loop header
LB: loop body
LE: loop exit
PB: predicated region body
PF: predicated region fallthrough
CT: control target
= control target key end

     0   :  { %10 = vsyncpa [#allocation3], 0  ;;  %s2299_s0 = inlined_call_operand.hbm [shape: f32[2,2700], index: 0, kind: input, shape index: {}]   ;;  %s2300_s1 = inlined_call_operand.hbm [shape: f32[2700,128], index: 1, kind: input, shape index: {}]   ;;  %s2301_s2 = inlined_call_operand.hbm [shape: f32[1,128], index: 2, kind: input, shape index: {}]   ;;  %s2302_s3 = inlined_call_operand.hbm [shape: f32[128,128], index: 3, kind: input, shape index: {}]   ;;  %s2303_s4 = inlined_call_operand.hbm [shape: f32[1,128], index: 4, kind: input, shape index: {}]   ;;  %s2304_s5 = inlined_call_operand.hbm [shape: f32[2,128], index: 5, kind: output, shape index: {}]  }
   0x1   :  { %11 = vsyncpa [#allocation6], 0 }
   0x2   :  { %12 = vsyncpa [#allocation9], 0 }
   0x3   :  { %13 = vsyncpa [#allocation4], 0 }
   0x4   :  { %18 = vsyncadd [#allocation3], 2112  ;;  %s2169_s18 = smov [#allocation5]  }
   0x5   :  { %s31_s19 = sshll.u32 %s2169_s18, 4  ;;  %s32_s19 = int_to_ptr.vmem [resolvable:$true] %s31_s19 }
   0x6   :  { %s2049_s20 = scalar_lea.vmem %s32_s19, 43264  ;;  %p2054_p1 = scmp.lt.s32.totalorder %s32_s19, %s32_s19 }
   0x7   :  { %p2050_p0 = scmp.ne.s32.totalorder %s32_s19, %s2049_s20  ;;  %p2055_p2 = scmp.lt.s32.totalorder %s2049_s20, %s2049_s20 }
   0x9   :  { %p2056_p3 = por %p2055_p2, %p2054_p1 }
   0xb   :  { %p2057_p4 = pnand %p2056_p3, %p2050_p0 }
   0xd   :  { %2060 = shalt.err (!%p2057_p4)
}
   0xe   :  { %s2170_s21 = smov 128   ;;  %s2171_s22 = smov 8  }
   0xf   :  { %37 = dma.hbm_to_vmem [thread:$0]  %s2300_s1, 43264, %s32_s19, [#allocation6], %s2170_s21, %s2170_s21, %s2171_s22  }
  0x10   :  { %s2172_s25 = smov [#allocation8]   ;;  %s2173_s27 = smov [#allocation2]  }
  0x11   :  { %s53_s26 = sshll.u32 %s2172_s25, 4  ;;  %s19_s28 = sshll.u32 %s2173_s27, 4  ;;  %s54_s26 = int_to_ptr.vmem [resolvable:$true] %s53_s26  ;;  %s20_s28 = int_to_ptr.vmem [resolvable:$true] %s19_s28 }
  0x12   :  { %s2069_s29 = scalar_lea.vmem %s54_s26, 2048  ;;  %p2074_p6 = scmp.lt.s32.totalorder %s54_s26, %s54_s26 }
  0x13   :  { %p2070_p5 = scmp.ne.s32.totalorder %s54_s26, %s2069_s29  ;;  %p2075_p7 = scmp.lt.s32.totalorder %s2069_s29, %s2069_s29 }
  0x15   :  { %p2076_p8 = por %p2075_p7, %p2074_p6 }
  0x17   :  { %p2077_p9 = pnand %p2076_p8, %p2070_p5 }
  0x19   :  { %2080 = shalt.err (!%p2077_p9)
}
  0x1a   :  { %59 = dma.hbm_to_vmem [thread:$0]  %s2302_s3, 2048, %s54_s26, [#allocation9], %s2170_s21, %s2170_s21, %s2171_s22  }
  0x1b   :  { %s2089_s7 = scalar_lea.vmem %s20_s28, 704  ;;  %s2093_s1 = scalar_lea.vmem %s20_s28, 2816 }
  0x1c   :  { %p2090_p10 = scmp.ne.s32.totalorder %s20_s28, %s2089_s7  ;;  %p2094_p11 = scmp.lt.s32.totalorder %s20_s28, %s20_s28 }
  0x1d   :  { %p2095_p12 = scmp.lt.s32.totalorder %s2093_s1, %s2089_s7 }
  0x1f   :  { %p2096_p13 = por %p2095_p12, %p2094_p11 }
  0x21   :  { %p2097_p0 = pnand %p2096_p13, %p2090_p10 }
  0x23   :  { %2100 = shalt.err (!%p2097_p0)
}
  0x24   :  { %s2174_s8 = smov 704   ;;  %s2175_s9 = smov 44  }
  0x25   :  { %25 = dma.hbm_to_vmem [thread:$0]  %s2299_s0, 704, %s20_s28, [#allocation3], %s2174_s8, %s2174_s8, %s2175_s9  }
  0x26   :  { %s2176_s12 = smov [#allocation7]   ;;  %s2177_s14 = smov [#allocation10]  }
  0x27   :  { %s44_s13 = sshll.u32 %s2176_s12, 4  ;;  %s66_s3 = sshll.u32 %s2177_s14, 4  ;;  %s45_s13 = int_to_ptr.vmem [resolvable:$true] %s44_s13  ;;  %s67_s3 = int_to_ptr.vmem [resolvable:$true] %s66_s3 }
  0x28   :  { %s2109_s15 = scalar_lea.vmem %s45_s13, 16  ;;  %s2113_s16 = scalar_lea.vmem %s45_s13, 32 }
  0x29   :  { %p2110_p1 = scmp.ne.s32.totalorder %s45_s13, %s2109_s15  ;;  %p2114_p2 = scmp.lt.s32.totalorder %s45_s13, %s45_s13 }
  0x2a   :  { %p2115_p3 = scmp.lt.s32.totalorder %s2113_s16, %s2109_s15 }
  0x2c   :  { %p2116_p4 = por %p2115_p3, %p2114_p2 }
  0x2e   :  { %p2117_p5 = pnand %p2116_p4, %p2110_p1 }
  0x30   :  { %2120 = shalt.err (!%p2117_p5)
}
  0x31   :  { %47 = dma.hbm_to_vmem [thread:$0]  %s2301_s2, 16, %s45_s13, [#allocation6]  }
  0x32   :  { %s2129_s19 = scalar_lea.vmem %s67_s3, 16  ;;  %s2133_s0 = scalar_lea.vmem %s67_s3, 32 }
  0x33   :  { %p2130_p6 = scmp.ne.s32.totalorder %s67_s3, %s2129_s19  ;;  %p2134_p7 = scmp.lt.s32.totalorder %s67_s3, %s67_s3 }
  0x34   :  { %p2135_p8 = scmp.lt.s32.totalorder %s2133_s0, %s2129_s19 }
  0x36   :  { %p2136_p9 = por %p2135_p8, %p2134_p7 }
  0x38   :  { %p2137_p10 = pnand %p2136_p9, %p2130_p6 }
  0x3a   :  { %2140 = shalt.err (!%p2137_p10)
}
  0x3b   :  { %69 = dma.hbm_to_vmem [thread:$0]  %s2303_s4, 16, %s67_s3, [#allocation9]  }
  0x3c   :  { %2161 = dma.done.wait [#allocation3], 2816  }
  0x3d   :  { %2162 = vsyncadd [#allocation3], 4294964480 }
  0x3e   :  { %2163 = dma.done.wait [#allocation6], 43280  }
  0x3f   :  { %2164 = vsyncadd [#allocation6], 4294924016 }
  0x40   :  { %2165 = dma.done.wait [#allocation9], 2064  }
  0x41   :  { %2166 = vsyncadd [#allocation9], 4294965232  ;;  %v140_v0 = vld [vmem:[#allocation5 + $0xf8] sm:$0xff]  ;;  %v139_v2 = vld [vmem:[#allocation5 + $0xf0] sm:$0xff]  ;;  %v2178_v27 = vmov 1983009808   ;;  %v485_v29 = vlaneseq }
  0x42   :  { %v124_v1 = vld [vmem:[#allocation5 + $0x78] sm:$0xff]  ;;  %1592 = vmatprep.subr.mxu0 %v140_v0  ;;  %v123_v4 = vld [vmem:[#allocation5 + $0x70] sm:$0xff]  ;;  %v138_v6 = vld [vmem:[#allocation5 + $0xe8] sm:$0xff]  ;;  %v483_v28 = vunpack.c.l.s4 %v2178_v27  ;;  %vm697_vm0 = vcmask 97280   ;;  %vm700_vm1 = vcmask 1043456   ;;  %vm2180_vm2 = vmmov 0  }
  0x43   :  { %v172_v3 = vld [vmem:[#allocation5 + $0x1f8] sm:$0xff]  ;;  %1593 = vmatpush3.msra.mxu0 %v124_v1  ;;  %v171_v7 = vld [vmem:[#allocation5 + $0x1f0] sm:$0xff]  ;;  %v122_v8 = vld [vmem:[#allocation5 + $0x68] sm:$0xff]  ;;  %v486_v39 = vshrl.u32 %v485_v29, 7 }
  0x44   :  { %v156_v5 = vld [vmem:[#allocation5 + $0x178] sm:$0xff]  ;;  %1627 = vmatprep.subr.mxu1 %v172_v3  ;;  %1594 = vmatprep.subr.mxu0 %v139_v2  ;;  %v155_v9 = vld [vmem:[#allocation5 + $0x170] sm:$0xff]  ;;  %v170_v10 = vld [vmem:[#allocation5 + $0x1e8] sm:$0xff]  ;;  %v484_v38 = vunpack.c.0.s8 %v483_v28 }
  0x45   :  { %1628 = vmatpush3.msra.mxu1 %v156_v5  ;;  %1595 = vmatpush3.msra.mxu0 %v123_v4  ;;  %v137_v11 = vld [vmem:[#allocation5 + $0xe0] sm:$0xff]  ;;  %v154_v12 = vld [vmem:[#allocation5 + $0x168] sm:$0xff]  ;;  %v136_v15 = vld [vmem:[#allocation5 + $0xd8] sm:$0xff] }
  0x46   :  { %1629 = vmatprep.subr.mxu1 %v171_v7  ;;  %1596 = vmatprep.subr.mxu0 %v138_v6  ;;  %v121_v13 = vld [vmem:[#allocation5 + $0x60] sm:$0xff]  ;;  %v120_v17 = vld [vmem:[#allocation5 + $0x58] sm:$0xff]  ;;  %v135_v19 = vld [vmem:[#allocation5 + $0xd0] sm:$0xff]  ;;  %v2229_v51 = vsub.s32 %v484_v38, %v486_v39 }
  0x47   :  { %1630 = vmatpush3.msra.mxu1 %v155_v9  ;;  %v169_v14 = vld [vmem:[#allocation5 + $0x1e0] sm:$0xff]  ;;  %1597 = vmatpush3.msra.mxu0 %v122_v8  ;;  %v168_v18 = vld [vmem:[#allocation5 + $0x1d8] sm:$0xff]  ;;  %v119_v21 = vld [vmem:[#allocation5 + $0x50] sm:$0xff] }
  0x48   :  { %1631 = vmatprep.subr.mxu1 %v170_v10  ;;  %v153_v16 = vld [vmem:[#allocation5 + $0x160] sm:$0xff]  ;;  %1598 = vmatprep.subr.mxu0 %v137_v11  ;;  %v152_v20 = vld [vmem:[#allocation5 + $0x158] sm:$0xff]  ;;  %v167_v22 = vld [vmem:[#allocation5 + $0x1d0] sm:$0xff] }
  0x49   :  { %1632 = vmatpush3.msra.mxu1 %v154_v12  ;;  %1599 = vmatpush3.msra.mxu0 %v121_v13  ;;  %v134_v23 = vld [vmem:[#allocation5 + $0xc8] sm:$0xff]  ;;  %v151_v24 = vld [vmem:[#allocation5 + $0x150] sm:$0xff]  ;;  %v133_v30 = vld [vmem:[#allocation5 + $0xc0] sm:$0xff] }
  0x4a   :  { %1633 = vmatprep.subr.mxu1 %v169_v14  ;;  %1600 = vmatprep.subr.mxu0 %v136_v15  ;;  %v118_v25 = vld [vmem:[#allocation5 + $0x48] sm:$0xff]  ;;  %v117_v32 = vld [vmem:[#allocation5 + $0x40] sm:$0xff]  ;;  %v132_v34 = vld [vmem:[#allocation5 + $0xb8] sm:$0xff] }
  0x4b   :  { %1634 = vmatpush3.msra.mxu1 %v153_v16  ;;  %1601 = vmatpush3.msra.mxu0 %v120_v17  ;;  %v166_v26 = vld [vmem:[#allocation5 + $0x1c8] sm:$0xff]  ;;  %v165_v33 = vld [vmem:[#allocation5 + $0x1c0] sm:$0xff]  ;;  %v116_v36 = vld [vmem:[#allocation5 + $0x38] sm:$0xff] }
  0x4c   :  { %1635 = vmatprep.subr.mxu1 %v168_v18  ;;  %1602 = vmatprep.subr.mxu0 %v135_v19  ;;  %v150_v31 = vld [vmem:[#allocation5 + $0x148] sm:$0xff]  ;;  %v149_v35 = vld [vmem:[#allocation5 + $0x140] sm:$0xff]  ;;  %v164_v37 = vld [vmem:[#allocation5 + $0x1b8] sm:$0xff] }
  0x4d   :  { %1636 = vmatpush3.msra.mxu1 %v152_v20  ;;  %1603 = vmatpush3.msra.mxu0 %v119_v21  ;;  %v131_v40 = vld [vmem:[#allocation5 + $0xb0] sm:$0xff]  ;;  %v148_v41 = vld [vmem:[#allocation5 + $0x138] sm:$0xff]  ;;  %v130_v43 = vld [vmem:[#allocation5 + $0xa8] sm:$0xff] }
  0x4e   :  { %1637 = vmatprep.subr.mxu1 %v167_v22  ;;  %1604 = vmatprep.subr.mxu0 %v134_v23  ;;  %v115_v42 = vld [vmem:[#allocation5 + $0x30] sm:$0xff]  ;;  %v114_v45 = vld [vmem:[#allocation5 + $0x28] sm:$0xff]  ;;  %v129_v47 = vld [vmem:[#allocation5 + $0xa0] sm:$0xff] }
  0x4f   :  { %1638 = vmatpush3.msra.mxu1 %v151_v24  ;;  %1605 = vmatpush3.msra.mxu0 %v118_v25  ;;  %v163_v44 = vld [vmem:[#allocation5 + $0x1b0] sm:$0xff]  ;;  %v162_v48 = vld [vmem:[#allocation5 + $0x1a8] sm:$0xff]  ;;  %v113_v49 = vld [vmem:[#allocation5 + $0x20] sm:$0xff] }
  0x50   :  { %1639 = vmatprep.subr.mxu1 %v166_v26  ;;  %1606 = vmatprep.subr.mxu0 %v133_v30  ;;  %v147_v46 = vld [vmem:[#allocation5 + $0x130] sm:$0xff]  ;;  %v146_v50 = vld [vmem:[#allocation5 + $0x128] sm:$0xff]  ;;  %v161_v52 = vld [vmem:[#allocation5 + $0x1a0] sm:$0xff] }
  0x51   :  { %1640 = vmatpush3.msra.mxu1 %v150_v31  ;;  %1607 = vmatpush3.msra.mxu0 %v117_v32  ;;  %v2009_v53 = vld [vmem:[#allocation2] ss:$44 sps:$4 sm:$0xff]   ;;  %v145_v55 = vld [vmem:[#allocation5 + $0x120] sm:$0xff]  ;;  %v2011_v56 = vld [vmem:[#allocation2 + $0x58] ss:$44 sps:$4 sm:$0xff]  }
  0x52   :  { %1641 = vmatprep.subr.mxu1 %v165_v33  ;;  %1608 = vmatprep.subr.mxu0 %v132_v34  ;;  %v128_v54 = vld [vmem:[#allocation5 + $0x98] sm:$0xff]  ;;  %v488_v59 = vrot.slane %v2009_v53, %v2229_v51  ;;  %v2013_v60 = vld [vmem:[#allocation2 + $0x4] ss:$44 sps:$4 sm:$0xff]   ;;  %v502_v63 = vrot.slane %v2011_v56, %v2229_v51  ;;  %v126_v3 = vld [vmem:[#allocation5 + $0x88] sm:$0xff] }
  0x53   :  { %1642 = vmatpush3.msra.mxu1 %v149_v35  ;;  %1609 = vmatpush3.msra.mxu0 %v116_v36  ;;  %v112_v57 = vld [vmem:[#allocation5 + $0x18] sm:$0xff]  ;;  %v127_v61 = vld [vmem:[#allocation5 + $0x90] sm:$0xff]  ;;  %v110_v5 = vld [vmem:[#allocation5 + $0x8] sm:$0xff]  ;;  %v495_v8 = vrot.slane %v2013_v60, %v2229_v51 }
  0x54   :  { %1643 = vmatprep.subr.mxu1 %v164_v37  ;;  %1610 = vmatprep.subr.mxu0 %v131_v40  ;;  %v160_v58 = vld [vmem:[#allocation5 + $0x198] sm:$0xff]  ;;  %v111_v1 = vld [vmem:[#allocation5 + $0x10] sm:$0xff]  ;;  %v158_v6 = vld [vmem:[#allocation5 + $0x188] sm:$0xff]  ;;  %v511_v7 = vcombine.high %v488_v59, %v502_v63  ;;  %v510_v13 = vcombine.low %v488_v59, %v502_v63 }
  0x55   :  { %1644 = vmatpush3.msra.mxu1 %v148_v41  ;;  %1611 = vmatpush3.msra.mxu0 %v115_v42  ;;  %v144_v62 = vld [vmem:[#allocation5 + $0x118] sm:$0xff]  ;;  %v159_v2 = vld [vmem:[#allocation5 + $0x190] sm:$0xff]  ;;  %v125_v10 = vld [vmem:[#allocation5 + $0x80] sm:$0xff] }
  0x56   :  { %1645 = vmatprep.subr.mxu1 %v163_v44  ;;  %1612 = vmatprep.subr.mxu0 %v130_v43  ;;  %v2014_v0 = vld [vmem:[#allocation2 + $0x5c] ss:$44 sps:$4 sm:$0xff]   ;;  %v143_v4 = vld [vmem:[#allocation5 + $0x110] sm:$0xff]  ;;  %v109_v11 = vld [vmem:[#allocation5] sm:$0xff] }
  0x57   :  { %1646 = vmatpush3.msra.mxu1 %v147_v46  ;;  %1613 = vmatpush3.msra.mxu0 %v114_v45  ;;  %v509_v9 = vrot.slane %v2014_v0, %v2229_v51  ;;  %v142_v12 = vld [vmem:[#allocation5 + $0x108] sm:$0xff]  ;;  %v157_v14 = vld [vmem:[#allocation5 + $0x180] sm:$0xff]  ;;  %v204_v15 = vld [vmem:[#allocation5 + $0x2f8] sm:$0xff] }
  0x58   :  { %1647 = vmatprep.subr.mxu1 %v162_v48  ;;  %1614 = vmatprep.subr.mxu0 %v129_v47  ;;  %v141_v16 = vld [vmem:[#allocation5 + $0x100] sm:$0xff]  ;;  %v188_v18 = vld [vmem:[#allocation5 + $0x278] sm:$0xff]  ;;  %v203_v20 = vld [vmem:[#allocation5 + $0x2f0] sm:$0xff] }
  0x59   :  { %1648 = vmatpush3.msra.mxu1 %v146_v50  ;;  %1615 = vmatpush3.msra.mxu0 %v113_v49  ;;  %v513_v17 = vcombine.high %v495_v8, %v509_v9  ;;  %v512_v19 = vcombine.low %v495_v8, %v509_v9  ;;  %v236_v21 = vld [vmem:[#allocation5 + $0x3f8] sm:$0xff]  ;;  %v187_v22 = vld [vmem:[#allocation5 + $0x270] sm:$0xff]  ;;  %v202_v24 = vld [vmem:[#allocation5 + $0x2e8] sm:$0xff] }
  0x5a   :  { %1649 = vmatprep.subr.mxu1 %v161_v52  ;;  %1616 = vmatprep.subr.mxu0 %v128_v54  ;;  %v220_v23 = vld [vmem:[#allocation5 + $0x378] sm:$0xff]  ;;  %v235_v25 = vld [vmem:[#allocation5 + $0x3f0] sm:$0xff]  ;;  %v186_v26 = vld [vmem:[#allocation5 + $0x268] sm:$0xff] }
  0x5b   :  { %1650 = vmatpush3.msra.mxu1 %v145_v55  ;;  %1617 = vmatpush3.msra.mxu0 %v112_v57  ;;  %v219_v27 = vld [vmem:[#allocation5 + $0x370] sm:$0xff]  ;;  %v201_v28 = vld [vmem:[#allocation5 + $0x2e0] sm:$0xff]  ;;  %v234_v29 = vld [vmem:[#allocation5 + $0x3e8] sm:$0xff] }
  0x5c   :  { %1651 = vmatprep.subr.mxu1 %v160_v58  ;;  %1618 = vmatprep.subr.mxu0 %v127_v61  ;;  %v185_v30 = vld [vmem:[#allocation5 + $0x260] sm:$0xff]  ;;  %v218_v31 = vld [vmem:[#allocation5 + $0x368] sm:$0xff]  ;;  %v200_v32 = vld [vmem:[#allocation5 + $0x2d8] sm:$0xff] }
  0x5d   :  { %1652 = vmatpush3.msra.mxu1 %v144_v62  ;;  %1619 = vmatpush3.msra.mxu0 %v111_v1  ;;  %v233_v33 = vld [vmem:[#allocation5 + $0x3e0] sm:$0xff]  ;;  %v184_v34 = vld [vmem:[#allocation5 + $0x258] sm:$0xff]  ;;  %v199_v36 = vld [vmem:[#allocation5 + $0x2d0] sm:$0xff] }
  0x5e   :  { %1653 = vmatprep.subr.mxu1 %v159_v2  ;;  %1620 = vmatprep.subr.mxu0 %v126_v3  ;;  %v217_v35 = vld [vmem:[#allocation5 + $0x360] sm:$0xff]  ;;  %v232_v37 = vld [vmem:[#allocation5 + $0x3d8] sm:$0xff]  ;;  %v183_v38 = vld [vmem:[#allocation5 + $0x250] sm:$0xff] }
  0x5f   :  { %1654 = vmatpush3.msra.mxu1 %v143_v4  ;;  %1621 = vmatpush3.msra.mxu0 %v110_v5  ;;  %v216_v39 = vld [vmem:[#allocation5 + $0x358] sm:$0xff]  ;;  %v198_v40 = vld [vmem:[#allocation5 + $0x2c8] sm:$0xff]  ;;  %v231_v41 = vld [vmem:[#allocation5 + $0x3d0] sm:$0xff] }
  0x60   :  { %1655 = vmatprep.subr.mxu1 %v158_v6  ;;  %1622 = vmatprep.subr.mxu0 %v125_v10  ;;  %v182_v42 = vld [vmem:[#allocation5 + $0x248] sm:$0xff]  ;;  %v215_v43 = vld [vmem:[#allocation5 + $0x350] sm:$0xff]  ;;  %v197_v44 = vld [vmem:[#allocation5 + $0x2c0] sm:$0xff] }
  0x61   :  { %768 = vmatprep.mubr.f32.mxu0 %v511_v7  ;;  %1623 = vmatpush3.msra.mxu0 %v109_v11  ;;  %v230_v45 = vld [vmem:[#allocation5 + $0x3c8] sm:$0xff]  ;;  %v181_v46 = vld [vmem:[#allocation5 + $0x240] sm:$0xff]  ;;  %v196_v48 = vld [vmem:[#allocation5 + $0x2b8] sm:$0xff] }
  0x62   :  { %1656 = vmatpush3.msra.mxu1 %v142_v12  ;;  %769 = vmatmul.mubr.f32.vlgmr.msra.gmra.mxu0 %v510_v13  ;;  %v214_v47 = vld [vmem:[#allocation5 + $0x348] sm:$0xff]  ;;  %v229_v49 = vld [vmem:[#allocation5 + $0x3c0] sm:$0xff]  ;;  %v180_v50 = vld [vmem:[#allocation5 + $0x238] sm:$0xff] }
  0x63   :  { %1657 = vmatprep.subr.mxu1 %v157_v14  ;;  %1662 = vmatprep.subr.mxu0 %v204_v15  ;;  %v213_v52 = vld [vmem:[#allocation5 + $0x340] sm:$0xff]  ;;  %v195_v53 = vld [vmem:[#allocation5 + $0x2b0] sm:$0xff]  ;;  %v228_v54 = vld [vmem:[#allocation5 + $0x3b8] sm:$0xff] }
  0x64   :  { %1658 = vmatpush3.msra.mxu1 %v141_v16  ;;  %838 = vmatprep.mubr.f32.mxu1 %v513_v17  ;;  %v179_v55 = vld [vmem:[#allocation5 + $0x230] sm:$0xff]  ;;  %v212_v56 = vld [vmem:[#allocation5 + $0x338] sm:$0xff]  ;;  %v194_v57 = vld [vmem:[#allocation5 + $0x2a8] sm:$0xff] }
  0x65   :  { %1663 = vmatpush3.msra.mxu0 %v188_v18  ;;  %839 = vmatmul.mubr.f32.vlgmr.msra.gmra.mxu1 %v512_v19  ;;  %v227_v58 = vld [vmem:[#allocation5 + $0x3b0] sm:$0xff]  ;;  %v178_v59 = vld [vmem:[#allocation5 + $0x228] sm:$0xff]  ;;  %v193_v61 = vld [vmem:[#allocation5 + $0x2a0] sm:$0xff] }
  0x66   :  { %1664 = vmatprep.subr.mxu0 %v203_v20  ;;  %1697 = vmatprep.subr.mxu1 %v236_v21  ;;  %v211_v60 = vld [vmem:[#allocation5 + $0x330] sm:$0xff]  ;;  %v226_v62 = vld [vmem:[#allocation5 + $0x3a8] sm:$0xff]  ;;  %v177_v63 = vld [vmem:[#allocation5 + $0x220] sm:$0xff] }
  0x67   :  { %1665 = vmatpush3.msra.mxu0 %v187_v22  ;;  %1698 = vmatpush3.msra.mxu1 %v220_v23  ;;  %v2015_v0 = vld [vmem:[#allocation2 + $0x8] ss:$44 sps:$4 sm:$0xff]   ;;  %v2017_v1 = vld [vmem:[#allocation2 + $0x60] ss:$44 sps:$4 sm:$0xff]   ;;  %v210_v2 = vld [vmem:[#allocation5 + $0x328] sm:$0xff] }
  0x68   :  { %1666 = vmatprep.subr.mxu0 %v202_v24  ;;  %1699 = vmatprep.subr.mxu1 %v235_v25  ;;  %v192_v3 = vld [vmem:[#allocation5 + $0x298] sm:$0xff]  ;;  %v225_v4 = vld [vmem:[#allocation5 + $0x3a0] sm:$0xff]  ;;  %v191_v7 = vld [vmem:[#allocation5 + $0x290] sm:$0xff]  ;;  %v524_v12 = vrot.slane %v2015_v0, %v2229_v51  ;;  %v538_v13 = vrot.slane %v2017_v1, %v2229_v51 }
  0x69   :  { %1667 = vmatpush3.msra.mxu0 %v186_v26  ;;  %1700 = vmatpush3.msra.mxu1 %v219_v27  ;;  %v176_v5 = vld [vmem:[#allocation5 + $0x218] sm:$0xff]  ;;  %v209_v6 = vld [vmem:[#allocation5 + $0x320] sm:$0xff]  ;;  %v175_v11 = vld [vmem:[#allocation5 + $0x210] sm:$0xff] }
  0x6a   :  { %1668 = vmatprep.subr.mxu0 %v201_v28  ;;  %1701 = vmatprep.subr.mxu1 %v234_v29  ;;  %v2019_v8 = vld [vmem:[#allocation2 + $0xc] ss:$44 sps:$4 sm:$0xff]   ;;  %v2020_v9 = vld [vmem:[#allocation2 + $0x64] ss:$44 sps:$4 sm:$0xff]   ;;  %v547_v24 = vcombine.high %v524_v12, %v538_v13  ;;  %v546_v26 = vcombine.low %v524_v12, %v538_v13 }
  0x6b   :  { %1669 = vmatpush3.msra.mxu0 %v185_v30  ;;  %1702 = vmatpush3.msra.mxu1 %v218_v31  ;;  %v224_v10 = vld [vmem:[#allocation5 + $0x398] sm:$0xff]  ;;  %v190_v15 = vld [vmem:[#allocation5 + $0x288] sm:$0xff]  ;;  %v223_v16 = vld [vmem:[#allocation5 + $0x390] sm:$0xff]  ;;  %v531_v20 = vrot.slane %v2019_v8, %v2229_v51  ;;  %v545_v21 = vrot.slane %v2020_v9, %v2229_v51 }
  0x6c   :  { %1670 = vmatprep.subr.mxu0 %v200_v32  ;;  %1703 = vmatprep.subr.mxu1 %v233_v33  ;;  %v208_v14 = vld [vmem:[#allocation5 + $0x318] sm:$0xff]  ;;  %v174_v17 = vld [vmem:[#allocation5 + $0x208] sm:$0xff]  ;;  %v207_v18 = vld [vmem:[#allocation5 + $0x310] sm:$0xff] }
  0x6d   :  { %1671 = vmatpush3.msra.mxu0 %v184_v34  ;;  %1704 = vmatpush3.msra.mxu1 %v217_v35  ;;  %v189_v19 = vld [vmem:[#allocation5 + $0x280] sm:$0xff]  ;;  %v222_v22 = vld [vmem:[#allocation5 + $0x388] sm:$0xff]  ;;  %v268_v28 = vld [vmem:[#allocation5 + $0x4f8] sm:$0xff]  ;;  %v549_v30 = vcombine.high %v531_v20, %v545_v21  ;;  %v548_v32 = vcombine.low %v531_v20, %v545_v21 }
  0x6e   :  { %1672 = vmatprep.subr.mxu0 %v199_v36  ;;  %1705 = vmatprep.subr.mxu1 %v232_v37  ;;  %v173_v23 = vld [vmem:[#allocation5 + $0x200] sm:$0xff]  ;;  %v206_v25 = vld [vmem:[#allocation5 + $0x308] sm:$0xff]  ;;  %v252_v31 = vld [vmem:[#allocation5 + $0x478] sm:$0xff] }
  0x6f   :  { %1673 = vmatpush3.msra.mxu0 %v183_v38  ;;  %1706 = vmatpush3.msra.mxu1 %v216_v39  ;;  %v221_v27 = vld [vmem:[#allocation5 + $0x380] sm:$0xff]  ;;  %v267_v33 = vld [vmem:[#allocation5 + $0x4f0] sm:$0xff]  ;;  %v300_v34 = vld [vmem:[#allocation5 + $0x5f8] sm:$0xff] }
  0x70   :  { %1674 = vmatprep.subr.mxu0 %v198_v40  ;;  %1707 = vmatprep.subr.mxu1 %v231_v41  ;;  %v205_v29 = vld [vmem:[#allocation5 + $0x300] sm:$0xff]  ;;  %v251_v35 = vld [vmem:[#allocation5 + $0x470] sm:$0xff]  ;;  %v284_v36 = vld [vmem:[#allocation5 + $0x578] sm:$0xff] }
  0x71   :  { %1675 = vmatpush3.msra.mxu0 %v182_v42  ;;  %1708 = vmatpush3.msra.mxu1 %v215_v43  ;;  %v266_v37 = vld [vmem:[#allocation5 + $0x4e8] sm:$0xff]  ;;  %v299_v38 = vld [vmem:[#allocation5 + $0x5f0] sm:$0xff]  ;;  %v265_v41 = vld [vmem:[#allocation5 + $0x4e0] sm:$0xff] }
  0x72   :  { %1676 = vmatprep.subr.mxu0 %v197_v44  ;;  %1709 = vmatprep.subr.mxu1 %v230_v45  ;;  %v250_v39 = vld [vmem:[#allocation5 + $0x468] sm:$0xff]  ;;  %v283_v40 = vld [vmem:[#allocation5 + $0x570] sm:$0xff]  ;;  %v249_v43 = vld [vmem:[#allocation5 + $0x460] sm:$0xff] }
  0x73   :  { %1677 = vmatpush3.msra.mxu0 %v181_v46  ;;  %1710 = vmatpush3.msra.mxu1 %v214_v47  ;;  %v298_v42 = vld [vmem:[#allocation5 + $0x5e8] sm:$0xff]  ;;  %v264_v45 = vld [vmem:[#allocation5 + $0x4d8] sm:$0xff]  ;;  %v297_v46 = vld [vmem:[#allocation5 + $0x5e0] sm:$0xff] }
  0x74   :  { %1678 = vmatprep.subr.mxu0 %v196_v48  ;;  %1711 = vmatprep.subr.mxu1 %v229_v49  ;;  %v282_v44 = vld [vmem:[#allocation5 + $0x568] sm:$0xff]  ;;  %v248_v47 = vld [vmem:[#allocation5 + $0x458] sm:$0xff]  ;;  %v281_v48 = vld [vmem:[#allocation5 + $0x560] sm:$0xff] }
  0x75   :  { %1679 = vmatpush3.msra.mxu0 %v180_v50  ;;  %1712 = vmatpush3.msra.mxu1 %v213_v52  ;;  %v263_v49 = vld [vmem:[#allocation5 + $0x4d0] sm:$0xff]  ;;  %v296_v50 = vld [vmem:[#allocation5 + $0x5d8] sm:$0xff]  ;;  %v277_v1 = vld [vmem:[#allocation5 + $0x540] sm:$0xff] }
  0x76   :  { %1680 = vmatprep.subr.mxu0 %v195_v53  ;;  %1713 = vmatprep.subr.mxu1 %v228_v54  ;;  %v247_v52 = vld [vmem:[#allocation5 + $0x450] sm:$0xff]  ;;  %v280_v53 = vld [vmem:[#allocation5 + $0x558] sm:$0xff]  ;;  %v262_v54 = vld [vmem:[#allocation5 + $0x4c8] sm:$0xff] }
  0x77   :  { %1681 = vmatpush3.msra.mxu0 %v179_v55  ;;  %1714 = vmatpush3.msra.mxu1 %v212_v56  ;;  %v295_v55 = vld [vmem:[#allocation5 + $0x5d0] sm:$0xff]  ;;  %v246_v56 = vld [vmem:[#allocation5 + $0x448] sm:$0xff]  ;;  %v244_v0 = vld [vmem:[#allocation5 + $0x438] sm:$0xff] }
  0x78   :  { %1682 = vmatprep.subr.mxu0 %v194_v57  ;;  %1715 = vmatprep.subr.mxu1 %v227_v58  ;;  %v279_v57 = vld [vmem:[#allocation5 + $0x550] sm:$0xff]  ;;  %v261_v58 = vld [vmem:[#allocation5 + $0x4c0] sm:$0xff]  ;;  %v242_v8 = vld [vmem:[#allocation5 + $0x428] sm:$0xff] }
  0x79   :  { %1683 = vmatpush3.msra.mxu0 %v178_v59  ;;  %1716 = vmatpush3.msra.mxu1 %v211_v60  ;;  %v294_v59 = vld [vmem:[#allocation5 + $0x5c8] sm:$0xff]  ;;  %v245_v60 = vld [vmem:[#allocation5 + $0x440] sm:$0xff]  ;;  %v275_v9 = vld [vmem:[#allocation5 + $0x530] sm:$0xff] }
  0x7a   :  { %1684 = vmatprep.subr.mxu0 %v193_v61  ;;  %1717 = vmatprep.subr.mxu1 %v226_v62  ;;  %v278_v61 = vld [vmem:[#allocation5 + $0x548] sm:$0xff]  ;;  %v260_v62 = vld [vmem:[#allocation5 + $0x4b8] sm:$0xff]  ;;  %v241_v12 = vld [vmem:[#allocation5 + $0x420] sm:$0xff] }
  0x7b   :  { %1685 = vmatpush3.msra.mxu0 %v177_v63  ;;  %1718 = vmatpush3.msra.mxu1 %v210_v2  ;;  %v293_v63 = vld [vmem:[#allocation5 + $0x5c0] sm:$0xff]  ;;  %v259_v2 = vld [vmem:[#allocation5 + $0x4b0] sm:$0xff]  ;;  %v274_v13 = vld [vmem:[#allocation5 + $0x528] sm:$0xff] }
  0x7c   :  { %1686 = vmatprep.subr.mxu0 %v192_v3  ;;  %1719 = vmatprep.subr.mxu1 %v225_v4  ;;  %v292_v3 = vld [vmem:[#allocation5 + $0x5b8] sm:$0xff]  ;;  %v243_v4 = vld [vmem:[#allocation5 + $0x430] sm:$0xff] }
  0x7d   :  { %1687 = vmatpush3.msra.mxu0 %v176_v5  ;;  %1720 = vmatpush3.msra.mxu1 %v209_v6  ;;  %v276_v5 = vld [vmem:[#allocation5 + $0x538] sm:$0xff]  ;;  %v258_v6 = vld [vmem:[#allocation5 + $0x4a8] sm:$0xff]  ;;  %v255_v20 = vld [vmem:[#allocation5 + $0x490] sm:$0xff] }
  0x7e   :  { %1688 = vmatprep.subr.mxu0 %v191_v7  ;;  %1721 = vmatprep.subr.mxu1 %v224_v10  ;;  %v291_v7 = vld [vmem:[#allocation5 + $0x5b0] sm:$0xff]  ;;  %v257_v10 = vld [vmem:[#allocation5 + $0x4a0] sm:$0xff]  ;;  %v288_v21 = vld [vmem:[#allocation5 + $0x598] sm:$0xff] }
  0x7f   :  { %1689 = vmatpush3.msra.mxu0 %v175_v11  ;;  %1722 = vmatpush3.msra.mxu1 %v208_v14  ;;  %v290_v11 = vld [vmem:[#allocation5 + $0x5a8] sm:$0xff] }
  0x80   :  { %1690 = vmatprep.subr.mxu0 %v190_v15  ;;  %1723 = vmatprep.subr.mxu1 %v223_v16  ;;  %v2021_v14 = vld [vmem:[#allocation2 + $0x10] ss:$44 sps:$4 sm:$0xff]   ;;  %v2023_v15 = vld [vmem:[#allocation2 + $0x68] ss:$44 sps:$4 sm:$0xff]  }
  0x81   :  { %1691 = vmatpush3.msra.mxu0 %v174_v17  ;;  %1724 = vmatpush3.msra.mxu1 %v207_v18  ;;  %v256_v16 = vld [vmem:[#allocation5 + $0x498] sm:$0xff]  ;;  %v289_v17 = vld [vmem:[#allocation5 + $0x5a0] sm:$0xff] }
  0x82   :  { %1692 = vmatprep.subr.mxu0 %v189_v19  ;;  %1725 = vmatprep.subr.mxu1 %v222_v22  ;;  %v240_v18 = vld [vmem:[#allocation5 + $0x418] sm:$0xff]  ;;  %v273_v19 = vld [vmem:[#allocation5 + $0x520] sm:$0xff]  ;;  %v239_v22 = vld [vmem:[#allocation5 + $0x410] sm:$0xff] }
  0x83   :  { %1693 = vmatpush3.msra.mxu0 %v173_v23  ;;  %908 = vmatprep.mubr.f32.mxu0 %v547_v24  ;;  %v2025_v23 = vld [vmem:[#allocation2 + $0x14] ss:$44 sps:$4 sm:$0xff]   ;;  %v2026_v24 = vld [vmem:[#allocation2 + $0x6c] ss:$44 sps:$4 sm:$0xff]  }
  0x84   :  { %1726 = vmatpush3.msra.mxu1 %v206_v25  ;;  %909 = vmatmul.mubr.f32.vlgmr.msra.gmra.mxu0 %v546_v26  ;;  %v272_v25 = vld [vmem:[#allocation5 + $0x518] sm:$0xff]  ;;  %v560_v26 = vrot.slane %v2021_v14, %v2229_v51  ;;  %v341_v14 = vld [vmem:[#allocation5 + $0x740] sm:$0xff] }
  0x85   :  { %1727 = vmatprep.subr.mxu1 %v221_v27  ;;  %1732 = vmatprep.subr.mxu0 %v268_v28  ;;  %v574_v27 = vrot.slane %v2023_v15, %v2229_v51  ;;  %v254_v28 = vld [vmem:[#allocation5 + $0x488] sm:$0xff]  ;;  %v323_v15 = vld [vmem:[#allocation5 + $0x6b0] sm:$0xff] }
  0x86   :  { %1728 = vmatpush3.msra.mxu1 %v205_v29  ;;  %978 = vmatprep.mubr.f32.mxu1 %v549_v30  ;;  %v287_v29 = vld [vmem:[#allocation5 + $0x590] sm:$0xff]  ;;  %v238_v30 = vld [vmem:[#allocation5 + $0x408] sm:$0xff] }
  0x87   :  { %1733 = vmatpush3.msra.mxu0 %v252_v31  ;;  %979 = vmatmul.mubr.f32.vlgmr.msra.gmra.mxu1 %v548_v32  ;;  %v271_v31 = vld [vmem:[#allocation5 + $0x510] sm:$0xff]  ;;  %v253_v32 = vld [vmem:[#allocation5 + $0x480] sm:$0xff] }
  0x88   :  { %1734 = vmatprep.subr.mxu0 %v267_v33  ;;  %1767 = vmatprep.subr.mxu1 %v300_v34  ;;  %v567_v33 = vrot.slane %v2025_v23, %v2229_v51  ;;  %v581_v34 = vrot.slane %v2026_v24, %v2229_v51  ;;  %v321_v23 = vld [vmem:[#allocation5 + $0x6a0] sm:$0xff]  ;;  %v354_v24 = vld [vmem:[#allocation5 + $0x7a8] sm:$0xff] }
  0x89   :  { %1735 = vmatpush3.msra.mxu0 %v251_v35  ;;  %1768 = vmatpush3.msra.mxu1 %v284_v36  ;;  %v286_v35 = vld [vmem:[#allocation5 + $0x588] sm:$0xff]  ;;  %v237_v36 = vld [vmem:[#allocation5 + $0x400] sm:$0xff] }
  0x8a   :  { %1736 = vmatprep.subr.mxu0 %v266_v37  ;;  %1769 = vmatprep.subr.mxu1 %v299_v38  ;;  %v583_v37 = vcombine.high %v560_v26, %v574_v27  ;;  %v270_v38 = vld [vmem:[#allocation5 + $0x508] sm:$0xff] }
  0x8b   :  { %1737 = vmatpush3.msra.mxu0 %v250_v39  ;;  %1770 = vmatpush3.msra.mxu1 %v283_v40  ;;  %v582_v39 = vcombine.low %v560_v26, %v574_v27  ;;  %v285_v40 = vld [vmem:[#allocation5 + $0x580] sm:$0xff]  ;;  %v338_v26 = vld [vmem:[#allocation5 + $0x728] sm:$0xff] }
  0x8c   :  { %1738 = vmatprep.subr.mxu0 %v265_v41  ;;  %1771 = vmatprep.subr.mxu1 %v298_v42  ;;  %v332_v41 = vld [vmem:[#allocation5 + $0x6f8] sm:$0xff]  ;;  %v269_v42 = vld [vmem:[#allocation5 + $0x500] sm:$0xff]  ;;  %v2027_v27 = vld [vmem:[#allocation2 + $0x18] ss:$44 sps:$4 sm:$0xff]  }
  0x8d   :  { %1739 = vmatpush3.msra.mxu0 %v249_v43  ;;  %1772 = vmatpush3.msra.mxu1 %v282_v44  ;;  %v585_v43 = vcombine.high %v567_v33, %v581_v34  ;;  %v316_v44 = vld [vmem:[#allocation5 + $0x678] sm:$0xff] }
  0x8e   :  { %1740 = vmatprep.subr.mxu0 %v264_v45  ;;  %1773 = vmatprep.subr.mxu1 %v297_v46  ;;  %v584_v45 = vcombine.low %v567_v33, %v581_v34  ;;  %v331_v46 = vld [vmem:[#allocation5 + $0x6f0] sm:$0xff]  ;;  %v352_v34 = vld [vmem:[#allocation5 + $0x798] sm:$0xff] }
  0x8f   :  { %1741 = vmatpush3.msra.mxu0 %v248_v47  ;;  %1774 = vmatpush3.msra.mxu1 %v281_v48  ;;  %v364_v47 = vld [vmem:[#allocation5 + $0x7f8] sm:$0xff]  ;;  %v315_v48 = vld [vmem:[#allocation5 + $0x670] sm:$0xff] }
  0x90   :  { %1742 = vmatprep.subr.mxu0 %v263_v49  ;;  %1775 = vmatprep.subr.mxu1 %v296_v50  ;;  %v348_v49 = vld [vmem:[#allocation5 + $0x778] sm:$0xff]  ;;  %v330_v50 = vld [vmem:[#allocation5 + $0x6e8] sm:$0xff]  ;;  %v319_v33 = vld [vmem:[#allocation5 + $0x690] sm:$0xff] }
  0x91   :  { %1743 = vmatpush3.msra.mxu0 %v247_v52  ;;  %1776 = vmatpush3.msra.mxu1 %v280_v53  ;;  %v363_v52 = vld [vmem:[#allocation5 + $0x7f0] sm:$0xff]  ;;  %v314_v53 = vld [vmem:[#allocation5 + $0x668] sm:$0xff] }
  0x92   :  { %1744 = vmatprep.subr.mxu0 %v262_v54  ;;  %1777 = vmatprep.subr.mxu1 %v295_v55  ;;  %v347_v54 = vld [vmem:[#allocation5 + $0x770] sm:$0xff]  ;;  %v329_v55 = vld [vmem:[#allocation5 + $0x6e0] sm:$0xff] }
  0x93   :  { %1745 = vmatpush3.msra.mxu0 %v246_v56  ;;  %1778 = vmatpush3.msra.mxu1 %v279_v57  ;;  %v362_v56 = vld [vmem:[#allocation5 + $0x7e8] sm:$0xff]  ;;  %v313_v57 = vld [vmem:[#allocation5 + $0x660] sm:$0xff] }
  0x94   :  { %1746 = vmatprep.subr.mxu0 %v261_v58  ;;  %1779 = vmatprep.subr.mxu1 %v294_v59  ;;  %v346_v58 = vld [vmem:[#allocation5 + $0x768] sm:$0xff]  ;;  %v328_v59 = vld [vmem:[#allocation5 + $0x6d8] sm:$0xff] }
  0x95   :  { %1747 = vmatpush3.msra.mxu0 %v245_v60  ;;  %1780 = vmatpush3.msra.mxu1 %v278_v61  ;;  %v361_v60 = vld [vmem:[#allocation5 + $0x7e0] sm:$0xff]  ;;  %v312_v61 = vld [vmem:[#allocation5 + $0x658] sm:$0xff] }
  0x96   :  { %1748 = vmatprep.subr.mxu0 %v260_v62  ;;  %1781 = vmatprep.subr.mxu1 %v293_v63  ;;  %v345_v62 = vld [vmem:[#allocation5 + $0x760] sm:$0xff]  ;;  %v327_v63 = vld [vmem:[#allocation5 + $0x6d0] sm:$0xff] }
  0x97   :  { %1749 = vmatpush3.msra.mxu0 %v244_v0  ;;  %1782 = vmatpush3.msra.mxu1 %v277_v1  ;;  %v360_v0 = vld [vmem:[#allocation5 + $0x7d8] sm:$0xff]  ;;  %v311_v1 = vld [vmem:[#allocation5 + $0x650] sm:$0xff] }
  0x98   :  { %1750 = vmatprep.subr.mxu0 %v259_v2  ;;  %1783 = vmatprep.subr.mxu1 %v292_v3  ;;  %v344_v2 = vld [vmem:[#allocation5 + $0x758] sm:$0xff]  ;;  %v326_v3 = vld [vmem:[#allocation5 + $0x6c8] sm:$0xff] }
  0x99   :  { %1751 = vmatpush3.msra.mxu0 %v243_v4  ;;  %1784 = vmatpush3.msra.mxu1 %v276_v5  ;;  %v359_v4 = vld [vmem:[#allocation5 + $0x7d0] sm:$0xff]  ;;  %v310_v5 = vld [vmem:[#allocation5 + $0x648] sm:$0xff] }
  0x9a   :  { %1752 = vmatprep.subr.mxu0 %v258_v6  ;;  %1785 = vmatprep.subr.mxu1 %v291_v7  ;;  %v343_v6 = vld [vmem:[#allocation5 + $0x750] sm:$0xff]  ;;  %v325_v7 = vld [vmem:[#allocation5 + $0x6c0] sm:$0xff] }
  0x9b   :  { %1753 = vmatpush3.msra.mxu0 %v242_v8  ;;  %1786 = vmatpush3.msra.mxu1 %v275_v9  ;;  %v358_v8 = vld [vmem:[#allocation5 + $0x7c8] sm:$0xff]  ;;  %v309_v9 = vld [vmem:[#allocation5 + $0x640] sm:$0xff] }
  0x9c   :  { %1754 = vmatprep.subr.mxu0 %v257_v10  ;;  %1787 = vmatprep.subr.mxu1 %v290_v11  ;;  %v342_v10 = vld [vmem:[#allocation5 + $0x748] sm:$0xff]  ;;  %v324_v11 = vld [vmem:[#allocation5 + $0x6b8] sm:$0xff] }
  0x9d   :  { %1755 = vmatpush3.msra.mxu0 %v241_v12  ;;  %1788 = vmatpush3.msra.mxu1 %v274_v13  ;;  %v357_v12 = vld [vmem:[#allocation5 + $0x7c0] sm:$0xff]  ;;  %v308_v13 = vld [vmem:[#allocation5 + $0x638] sm:$0xff] }
  0x9e   :  { %1756 = vmatprep.subr.mxu0 %v256_v16  ;;  %1789 = vmatprep.subr.mxu1 %v289_v17  ;;  %v356_v16 = vld [vmem:[#allocation5 + $0x7b8] sm:$0xff]  ;;  %v307_v17 = vld [vmem:[#allocation5 + $0x630] sm:$0xff] }
  0x9f   :  { %1757 = vmatpush3.msra.mxu0 %v240_v18  ;;  %1790 = vmatpush3.msra.mxu1 %v273_v19  ;;  %v340_v18 = vld [vmem:[#allocation5 + $0x738] sm:$0xff]  ;;  %v322_v19 = vld [vmem:[#allocation5 + $0x6a8] sm:$0xff] }
  0xa0   :  { %1758 = vmatprep.subr.mxu0 %v255_v20  ;;  %1791 = vmatprep.subr.mxu1 %v288_v21  ;;  %v355_v20 = vld [vmem:[#allocation5 + $0x7b0] sm:$0xff]  ;;  %v306_v21 = vld [vmem:[#allocation5 + $0x628] sm:$0xff] }
  0xa1   :  { %1759 = vmatpush3.msra.mxu0 %v239_v22  ;;  %1792 = vmatpush3.msra.mxu1 %v272_v25  ;;  %v339_v22 = vld [vmem:[#allocation5 + $0x730] sm:$0xff]  ;;  %v305_v25 = vld [vmem:[#allocation5 + $0x620] sm:$0xff] }
  0xa2   :  { %1760 = vmatprep.subr.mxu0 %v254_v28  ;;  %1793 = vmatprep.subr.mxu1 %v287_v29  ;;  %v2029_v28 = vld [vmem:[#allocation2 + $0x70] ss:$44 sps:$4 sm:$0xff]   ;;  %v320_v29 = vld [vmem:[#allocation5 + $0x698] sm:$0xff] }
  0xa3   :  { %1761 = vmatpush3.msra.mxu0 %v238_v30  ;;  %1794 = vmatpush3.msra.mxu1 %v271_v31  ;;  %v353_v30 = vld [vmem:[#allocation5 + $0x7a0] sm:$0xff]  ;;  %v304_v31 = vld [vmem:[#allocation5 + $0x618] sm:$0xff] }
  0xa4   :  { %1762 = vmatprep.subr.mxu0 %v253_v32  ;;  %1795 = vmatprep.subr.mxu1 %v286_v35  ;;  %v337_v32 = vld [vmem:[#allocation5 + $0x720] sm:$0xff]  ;;  %v303_v35 = vld [vmem:[#allocation5 + $0x610] sm:$0xff] }
  0xa5   :  { %1763 = vmatpush3.msra.mxu0 %v237_v36  ;;  %1048 = vmatprep.mubr.f32.mxu0 %v583_v37  ;;  %v2031_v36 = vld [vmem:[#allocation2 + $0x1c] ss:$44 sps:$4 sm:$0xff]   ;;  %v2032_v37 = vld [vmem:[#allocation2 + $0x74] ss:$44 sps:$4 sm:$0xff]  }
  0xa6   :  { %1796 = vmatpush3.msra.mxu1 %v270_v38  ;;  %1049 = vmatmul.mubr.f32.vlgmr.msra.gmra.mxu0 %v582_v39  ;;  %v596_v38 = vrot.slane %v2027_v27, %v2229_v51  ;;  %v610_v39 = vrot.slane %v2029_v28, %v2229_v51  ;;  %v405_v27 = vld [vmem:[#allocation5 + $0x940] sm:$0xff]  ;;  %v387_v28 = vld [vmem:[#allocation5 + $0x8b0] sm:$0xff] }
  0xa7   :  { %1797 = vmatprep.subr.mxu1 %v285_v40  ;;  %1802 = vmatprep.subr.mxu0 %v332_v41  ;;  %v336_v40 = vld [vmem:[#allocation5 + $0x718] sm:$0xff]  ;;  %v318_v41 = vld [vmem:[#allocation5 + $0x688] sm:$0xff] }
  0xa8   :  { %1798 = vmatpush3.msra.mxu1 %v269_v42  ;;  %1118 = vmatprep.mubr.f32.mxu1 %v585_v43  ;;  %v351_v42 = vld [vmem:[#allocation5 + $0x790] sm:$0xff]  ;;  %v302_v43 = vld [vmem:[#allocation5 + $0x608] sm:$0xff] }
  0xa9   :  { %1803 = vmatpush3.msra.mxu0 %v316_v44  ;;  %1119 = vmatmul.mubr.f32.vlgmr.msra.gmra.mxu1 %v584_v45  ;;  %v335_v44 = vld [vmem:[#allocation5 + $0x710] sm:$0xff]  ;;  %v317_v45 = vld [vmem:[#allocation5 + $0x680] sm:$0xff] }
  0xaa   :  { %1804 = vmatprep.subr.mxu0 %v331_v46  ;;  %1837 = vmatprep.subr.mxu1 %v364_v47  ;;  %v603_v46 = vrot.slane %v2031_v36, %v2229_v51  ;;  %v617_v47 = vrot.slane %v2032_v37, %v2229_v51  ;;  %v385_v36 = vld [vmem:[#allocation5 + $0x8a0] sm:$0xff]  ;;  %v418_v37 = vld [vmem:[#allocation5 + $0x9a8] sm:$0xff] }
  0xab   :  { %1805 = vmatpush3.msra.mxu0 %v315_v48  ;;  %1838 = vmatpush3.msra.mxu1 %v348_v49  ;;  %v350_v48 = vld [vmem:[#allocation5 + $0x788] sm:$0xff]  ;;  %v301_v49 = vld [vmem:[#allocation5 + $0x600] sm:$0xff] }
  0xac   :  { %1806 = vmatprep.subr.mxu0 %v330_v50  ;;  %1839 = vmatprep.subr.mxu1 %v363_v52  ;;  %v619_v50 = vcombine.high %v596_v38, %v610_v39  ;;  %v334_v52 = vld [vmem:[#allocation5 + $0x708] sm:$0xff] }
  0xad   :  { %1807 = vmatpush3.msra.mxu0 %v314_v53  ;;  %1840 = vmatpush3.msra.mxu1 %v347_v54  ;;  %v618_v53 = vcombine.low %v596_v38, %v610_v39  ;;  %v349_v54 = vld [vmem:[#allocation5 + $0x780] sm:$0xff]  ;;  %v2033_v39 = vld [vmem:[#allocation2 + $0x20] ss:$44 sps:$4 sm:$0xff]  }
  0xae   :  { %1808 = vmatprep.subr.mxu0 %v329_v55  ;;  %1841 = vmatprep.subr.mxu1 %v362_v56  ;;  %v396_v55 = vld [vmem:[#allocation5 + $0x8f8] sm:$0xff]  ;;  %v333_v56 = vld [vmem:[#allocation5 + $0x700] sm:$0xff] }
  0xaf   :  { %1809 = vmatpush3.msra.mxu0 %v313_v57  ;;  %1842 = vmatpush3.msra.mxu1 %v346_v58  ;;  %v621_v57 = vcombine.high %v603_v46, %v617_v47  ;;  %v380_v58 = vld [vmem:[#allocation5 + $0x878] sm:$0xff]  ;;  %v369_v38 = vld [vmem:[#allocation5 + $0x820] sm:$0xff] }
  0xb0   :  { %1810 = vmatprep.subr.mxu0 %v328_v59  ;;  %1843 = vmatprep.subr.mxu1 %v361_v60  ;;  %v620_v59 = vcombine.low %v603_v46, %v617_v47  ;;  %v395_v60 = vld [vmem:[#allocation5 + $0x8f0] sm:$0xff] }
  0xb1   :  { %1811 = vmatpush3.msra.mxu0 %v312_v61  ;;  %1844 = vmatpush3.msra.mxu1 %v345_v62  ;;  %v428_v61 = vld [vmem:[#allocation5 + $0x9f8] sm:$0xff]  ;;  %v379_v62 = vld [vmem:[#allocation5 + $0x870] sm:$0xff] }
  0xb2   :  { %1812 = vmatprep.subr.mxu0 %v327_v63  ;;  %1845 = vmatprep.subr.mxu1 %v360_v0  ;;  %v412_v63 = vld [vmem:[#allocation5 + $0x978] sm:$0xff]  ;;  %v394_v0 = vld [vmem:[#allocation5 + $0x8e8] sm:$0xff]  ;;  %v383_v46 = vld [vmem:[#allocation5 + $0x890] sm:$0xff] }
  0xb3   :  { %1813 = vmatpush3.msra.mxu0 %v311_v1  ;;  %1846 = vmatpush3.msra.mxu1 %v344_v2  ;;  %v427_v1 = vld [vmem:[#allocation5 + $0x9f0] sm:$0xff]  ;;  %v378_v2 = vld [vmem:[#allocation5 + $0x868] sm:$0xff] }
  0xb4   :  { %1814 = vmatprep.subr.mxu0 %v326_v3  ;;  %1847 = vmatprep.subr.mxu1 %v359_v4  ;;  %v411_v3 = vld [vmem:[#allocation5 + $0x970] sm:$0xff]  ;;  %v393_v4 = vld [vmem:[#allocation5 + $0x8e0] sm:$0xff] }
  0xb5   :  { %1815 = vmatpush3.msra.mxu0 %v310_v5  ;;  %1848 = vmatpush3.msra.mxu1 %v343_v6  ;;  %v426_v5 = vld [vmem:[#allocation5 + $0x9e8] sm:$0xff]  ;;  %v377_v6 = vld [vmem:[#allocation5 + $0x860] sm:$0xff] }
  0xb6   :  { %1816 = vmatprep.subr.mxu0 %v325_v7  ;;  %1849 = vmatprep.subr.mxu1 %v358_v8  ;;  %v410_v7 = vld [vmem:[#allocation5 + $0x968] sm:$0xff]  ;;  %v392_v8 = vld [vmem:[#allocation5 + $0x8d8] sm:$0xff]  ;;  %v2037_v47 = vld [vmem:[#allocation2 + $0x24] ss:$44 sps:$4 sm:$0xff]  }
  0xb7   :  { %1817 = vmatpush3.msra.mxu0 %v309_v9  ;;  %1850 = vmatpush3.msra.mxu1 %v342_v10  ;;  %v425_v9 = vld [vmem:[#allocation5 + $0x9e0] sm:$0xff]  ;;  %v376_v10 = vld [vmem:[#allocation5 + $0x858] sm:$0xff] }
  0xb8   :  { %1818 = vmatprep.subr.mxu0 %v324_v11  ;;  %1851 = vmatprep.subr.mxu1 %v357_v12  ;;  %v409_v11 = vld [vmem:[#allocation5 + $0x960] sm:$0xff]  ;;  %v391_v12 = vld [vmem:[#allocation5 + $0x8d0] sm:$0xff] }
  0xb9   :  { %1819 = vmatpush3.msra.mxu0 %v308_v13  ;;  %1852 = vmatpush3.msra.mxu1 %v341_v14  ;;  %v424_v13 = vld [vmem:[#allocation5 + $0x9d8] sm:$0xff]  ;;  %v375_v14 = vld [vmem:[#allocation5 + $0x850] sm:$0xff] }
  0xba   :  { %1820 = vmatprep.subr.mxu0 %v323_v15  ;;  %1853 = vmatprep.subr.mxu1 %v356_v16  ;;  %v408_v15 = vld [vmem:[#allocation5 + $0x958] sm:$0xff]  ;;  %v390_v16 = vld [vmem:[#allocation5 + $0x8c8] sm:$0xff] }
  0xbb   :  { %1821 = vmatpush3.msra.mxu0 %v307_v17  ;;  %1854 = vmatpush3.msra.mxu1 %v340_v18  ;;  %v423_v17 = vld [vmem:[#allocation5 + $0x9d0] sm:$0xff]  ;;  %v374_v18 = vld [vmem:[#allocation5 + $0x848] sm:$0xff] }
  0xbc   :  { %1822 = vmatprep.subr.mxu0 %v322_v19  ;;  %1855 = vmatprep.subr.mxu1 %v355_v20  ;;  %v407_v19 = vld [vmem:[#allocation5 + $0x950] sm:$0xff]  ;;  %v389_v20 = vld [vmem:[#allocation5 + $0x8c0] sm:$0xff] }
  0xbd   :  { %1823 = vmatpush3.msra.mxu0 %v306_v21  ;;  %1856 = vmatpush3.msra.mxu1 %v339_v22  ;;  %v422_v21 = vld [vmem:[#allocation5 + $0x9c8] sm:$0xff]  ;;  %v373_v22 = vld [vmem:[#allocation5 + $0x840] sm:$0xff] }
  0xbe   :  { %1824 = vmatprep.subr.mxu0 %v321_v23  ;;  %1857 = vmatprep.subr.mxu1 %v354_v24  ;;  %v406_v23 = vld [vmem:[#allocation5 + $0x948] sm:$0xff]  ;;  %v388_v24 = vld [vmem:[#allocation5 + $0x8b8] sm:$0xff] }
  0xbf   :  { %1825 = vmatpush3.msra.mxu0 %v305_v25  ;;  %1858 = vmatpush3.msra.mxu1 %v338_v26  ;;  %v421_v25 = vld [vmem:[#allocation5 + $0x9c0] sm:$0xff]  ;;  %v372_v26 = vld [vmem:[#allocation5 + $0x838] sm:$0xff] }
  0xc0   :  { %1826 = vmatprep.subr.mxu0 %v320_v29  ;;  %1859 = vmatprep.subr.mxu1 %v353_v30  ;;  %v420_v29 = vld [vmem:[#allocation5 + $0x9b8] sm:$0xff]  ;;  %v371_v30 = vld [vmem:[#allocation5 + $0x830] sm:$0xff] }
  0xc1   :  { %1827 = vmatpush3.msra.mxu0 %v304_v31  ;;  %1860 = vmatpush3.msra.mxu1 %v337_v32  ;;  %v404_v31 = vld [vmem:[#allocation5 + $0x938] sm:$0xff]  ;;  %v386_v32 = vld [vmem:[#allocation5 + $0x8a8] sm:$0xff] }
  0xc2   :  { %1828 = vmatprep.subr.mxu0 %v319_v33  ;;  %1861 = vmatprep.subr.mxu1 %v352_v34  ;;  %v419_v33 = vld [vmem:[#allocation5 + $0x9b0] sm:$0xff]  ;;  %v370_v34 = vld [vmem:[#allocation5 + $0x828] sm:$0xff] }
  0xc3   :  { %1829 = vmatpush3.msra.mxu0 %v303_v35  ;;  %1862 = vmatpush3.msra.mxu1 %v336_v40  ;;  %v403_v35 = vld [vmem:[#allocation5 + $0x930] sm:$0xff] }
  0xc4   :  { %1830 = vmatprep.subr.mxu0 %v318_v41  ;;  %1863 = vmatprep.subr.mxu1 %v351_v42  ;;  %v2035_v40 = vld [vmem:[#allocation2 + $0x78] ss:$44 sps:$4 sm:$0xff]   ;;  %v384_v42 = vld [vmem:[#allocation5 + $0x898] sm:$0xff] }
  0xc5   :  { %1831 = vmatpush3.msra.mxu0 %v302_v43  ;;  %1864 = vmatpush3.msra.mxu1 %v335_v44  ;;  %v402_v41 = vld [vmem:[#allocation5 + $0x928] sm:$0xff]  ;;  %v417_v43 = vld [vmem:[#allocation5 + $0x9a0] sm:$0xff]  ;;  %v368_v44 = vld [vmem:[#allocation5 + $0x818] sm:$0xff] }
  0xc6   :  { %1832 = vmatprep.subr.mxu0 %v317_v45  ;;  %1865 = vmatprep.subr.mxu1 %v350_v48  ;;  %v401_v45 = vld [vmem:[#allocation5 + $0x920] sm:$0xff]  ;;  %v2038_v48 = vld [vmem:[#allocation2 + $0x7c] ss:$44 sps:$4 sm:$0xff]  }
  0xc7   :  { %1833 = vmatpush3.msra.mxu0 %v301_v49  ;;  %1188 = vmatprep.mubr.f32.mxu0 %v619_v50  ;;  %v416_v49 = vld [vmem:[#allocation5 + $0x998] sm:$0xff]  ;;  %v367_v50 = vld [vmem:[#allocation5 + $0x810] sm:$0xff] }
  0xc8   :  { %1866 = vmatpush3.msra.mxu1 %v334_v52  ;;  %1189 = vmatmul.mubr.f32.vlgmr.msra.gmra.mxu0 %v618_v53  ;;  %v400_v52 = vld [vmem:[#allocation5 + $0x918] sm:$0xff]  ;;  %v632_v53 = vrot.slane %v2033_v39, %v2229_v51  ;;  %v1482_v39 = vld [vmem:[#allocation8 + $0x38] sm:$0xff] }
  0xc9   :  { %1867 = vmatprep.subr.mxu1 %v349_v54  ;;  %1872 = vmatprep.subr.mxu0 %v396_v55  ;;  %v646_v54 = vrot.slane %v2035_v40, %v2229_v51  ;;  %v382_v55 = vld [vmem:[#allocation5 + $0x888] sm:$0xff] }
  0xca   :  { %1868 = vmatpush3.msra.mxu1 %v333_v56  ;;  %1258 = vmatprep.mubr.f32.mxu1 %v621_v57  ;;  %v2039_v56 = vld [vmem:[#allocation2 + $0x28] ss:$44 sps:$4 sm:$0xff]   ;;  %v2040_v57 = vld [vmem:[#allocation2 + $0x80] ss:$44 sps:$4 sm:$0xff]  }
  0xcb   :  { %1873 = vmatpush3.msra.mxu0 %v380_v58  ;;  %1259 = vmatmul.mubr.f32.vlgmr.msra.gmra.mxu1 %v620_v59  ;;  %v415_v58 = vld [vmem:[#allocation5 + $0x990] sm:$0xff]  ;;  %v366_v59 = vld [vmem:[#allocation5 + $0x808] sm:$0xff] }
  0xcc   :  { %1874 = vmatprep.subr.mxu0 %v395_v60  ;;  %1907 = vmatprep.subr.mxu1 %v428_v61  ;;  %v399_v60 = vld [vmem:[#allocation5 + $0x910] sm:$0xff]  ;;  %v381_v61 = vld [vmem:[#allocation5 + $0x880] sm:$0xff] }
  0xcd   :  { %1875 = vmatpush3.msra.mxu0 %v379_v62  ;;  %1908 = vmatpush3.msra.mxu1 %v412_v63  ;;  %v639_v62 = vrot.slane %v2037_v47, %v2229_v51  ;;  %v653_v63 = vrot.slane %v2038_v48, %v2229_v51  ;;  %v1481_v40 = vld [vmem:[#allocation8 + $0x30] sm:$0xff] }
  0xce   :  { %1876 = vmatprep.subr.mxu0 %v394_v0  ;;  %1909 = vmatprep.subr.mxu1 %v427_v1  ;;  %v414_v0 = vld [vmem:[#allocation5 + $0x988] sm:$0xff]  ;;  %v365_v1 = vld [vmem:[#allocation5 + $0x800] sm:$0xff] }
  0xcf   :  { %1877 = vmatpush3.msra.mxu0 %v378_v2  ;;  %1910 = vmatpush3.msra.mxu1 %v411_v3  ;;  %v655_v2 = vcombine.high %v632_v53, %v646_v54  ;;  %v398_v3 = vld [vmem:[#allocation5 + $0x908] sm:$0xff] }
  0xd0   :  { %1878 = vmatprep.subr.mxu0 %v393_v4  ;;  %1911 = vmatprep.subr.mxu1 %v426_v5  ;;  %v654_v4 = vcombine.low %v632_v53, %v646_v54  ;;  %v2252_v5 = vrot.slane %v2039_v56, %v2229_v51  ;;  %v1588_v53 = vld [vmem:[#allocation7] ss:$0 sm:$0xff] }
  0xd1   :  { %1879 = vmatpush3.msra.mxu0 %v377_v6  ;;  %1912 = vmatpush3.msra.mxu1 %v410_v7  ;;  %v2255_v6 = vrot.slane %v2040_v57, %v2229_v51  ;;  %v413_v7 = vld [vmem:[#allocation5 + $0x980] sm:$0xff]  ;;  %v443_v51 = vld [vmem:[#allocation5 + $0xa70] sm:$0xff] }
  0xd2   :  { %1880 = vmatprep.subr.mxu0 %v392_v8  ;;  %1913 = vmatprep.subr.mxu1 %v425_v9  ;;  %v397_v8 = vld [vmem:[#allocation5 + $0x900] sm:$0xff]  ;;  %v657_v9 = vcombine.high %v639_v62, %v653_v63 }
  0xd3   :  { %1881 = vmatpush3.msra.mxu0 %v376_v10  ;;  %1914 = vmatpush3.msra.mxu1 %v409_v11  ;;  %v444_v10 = vld [vmem:[#allocation5 + $0xa78] sm:$0xff]  ;;  %v656_v11 = vcombine.low %v639_v62, %v653_v63 }
  0xd4   :  { %1882 = vmatprep.subr.mxu0 %v391_v12  ;;  %1915 = vmatprep.subr.mxu1 %v424_v13  ;;  %v675_v12 = vcombine.high %v2252_v5, %v2255_v6  ;;  %v2179_v13 = vmov 0.0  }
  0xd5   :  { %1883 = vmatpush3.msra.mxu0 %v375_v14  ;;  %1916 = vmatpush3.msra.mxu1 %v408_v15  ;;  %v442_v14 = vld [vmem:[#allocation5 + $0xa68] sm:$0xff]  ;;  %v441_v15 = vld [vmem:[#allocation5 + $0xa60] sm:$0xff] }
  0xd6   :  { %1884 = vmatprep.subr.mxu0 %v390_v16  ;;  %1917 = vmatprep.subr.mxu1 %v423_v17  ;;  %v440_v16 = vld [vmem:[#allocation5 + $0xa58] sm:$0xff]  ;;  %v439_v17 = vld [vmem:[#allocation5 + $0xa50] sm:$0xff] }
  0xd7   :  { %1885 = vmatpush3.msra.mxu0 %v374_v18  ;;  %1918 = vmatpush3.msra.mxu1 %v407_v19  ;;  %v438_v18 = vld [vmem:[#allocation5 + $0xa48] sm:$0xff]  ;;  %v437_v19 = vld [vmem:[#allocation5 + $0xa40] sm:$0xff] }
  0xd8   :  { %1886 = vmatprep.subr.mxu0 %v389_v20  ;;  %1919 = vmatprep.subr.mxu1 %v422_v21  ;;  %v436_v20 = vld [vmem:[#allocation5 + $0xa38] sm:$0xff]  ;;  %v435_v21 = vld [vmem:[#allocation5 + $0xa30] sm:$0xff] }
  0xd9   :  { %1887 = vmatpush3.msra.mxu0 %v373_v22  ;;  %1920 = vmatpush3.msra.mxu1 %v406_v23  ;;  %v434_v22 = vld [vmem:[#allocation5 + $0xa28] sm:$0xff]  ;;  %v433_v23 = vld [vmem:[#allocation5 + $0xa20] sm:$0xff] }
  0xda   :  { %1888 = vmatprep.subr.mxu0 %v388_v24  ;;  %1921 = vmatprep.subr.mxu1 %v421_v25  ;;  %v432_v24 = vld [vmem:[#allocation5 + $0xa18] sm:$0xff]  ;;  %v431_v25 = vld [vmem:[#allocation5 + $0xa10] sm:$0xff] }
  0xdb   :  { %1889 = vmatpush3.msra.mxu0 %v372_v26  ;;  %1922 = vmatpush3.msra.mxu1 %v405_v27  ;;  %v430_v26 = vld [vmem:[#allocation5 + $0xa08] sm:$0xff]  ;;  %v429_v27 = vld [vmem:[#allocation5 + $0xa00] sm:$0xff] }
  0xdc   :  { %1890 = vmatprep.subr.mxu0 %v387_v28  ;;  %1923 = vmatprep.subr.mxu1 %v420_v29  ;;  %v446_v28 = vld [vmem:[#allocation5 + $0xa88] sm:$0xf]  ;;  %v445_v29 = vld [vmem:[#allocation5 + $0xa80] sm:$0xff] }
  0xdd   :  { %1891 = vmatpush3.msra.mxu0 %v371_v30  ;;  %1924 = vmatpush3.msra.mxu1 %v404_v31  ;;  %v674_v30 = vcombine.low %v2252_v5, %v2255_v6  ;;  %v1490_v31 = vld [vmem:[#allocation8 + $0x78] sm:$0xff] }
  0xde   :  { %1892 = vmatprep.subr.mxu0 %v386_v32  ;;  %1925 = vmatprep.subr.mxu1 %v419_v33  ;;  %v1489_v32 = vld [vmem:[#allocation8 + $0x70] sm:$0xff]  ;;  %v1488_v33 = vld [vmem:[#allocation8 + $0x68] sm:$0xff] }
  0xdf   :  { %1893 = vmatpush3.msra.mxu0 %v370_v34  ;;  %1926 = vmatpush3.msra.mxu1 %v403_v35  ;;  %v1487_v34 = vld [vmem:[#allocation8 + $0x60] sm:$0xff]  ;;  %v1486_v35 = vld [vmem:[#allocation8 + $0x58] sm:$0xff] }
  0xe0   :  { %1894 = vmatprep.subr.mxu0 %v385_v36  ;;  %1927 = vmatprep.subr.mxu1 %v418_v37  ;;  %v1485_v36 = vld [vmem:[#allocation8 + $0x50] sm:$0xff]  ;;  %v1484_v37 = vld [vmem:[#allocation8 + $0x48] sm:$0xff] }
  0xe1   :  { %1895 = vmatpush3.msra.mxu0 %v369_v38  ;;  %1928 = vmatpush3.msra.mxu1 %v402_v41  ;;  %v1483_v38 = vld [vmem:[#allocation8 + $0x40] sm:$0xff]  ;;  %v1480_v41 = vld [vmem:[#allocation8 + $0x28] sm:$0xff] }
  0xe2   :  { %1896 = vmatprep.subr.mxu0 %v384_v42  ;;  %1929 = vmatprep.subr.mxu1 %v417_v43  ;;  %v1479_v42 = vld [vmem:[#allocation8 + $0x20] sm:$0xff]  ;;  %v1478_v43 = vld [vmem:[#allocation8 + $0x18] sm:$0xff] }
  0xe3   :  { %1897 = vmatpush3.msra.mxu0 %v368_v44  ;;  %1930 = vmatpush3.msra.mxu1 %v401_v45  ;;  %v1477_v44 = vld [vmem:[#allocation8 + $0x10] sm:$0xff]  ;;  %v1476_v45 = vld [vmem:[#allocation8 + $0x8] sm:$0xff] }
  0xe4   :  { %1898 = vmatprep.subr.mxu0 %v383_v46  ;;  %1931 = vmatprep.subr.mxu1 %v416_v49  ;;  %v1475_v46 = vld [vmem:[#allocation8] sm:$0xff] }
  0xe5   :  { %1899 = vmatpush3.msra.mxu0 %v367_v50  ;;  %1932 = vmatpush3.msra.mxu1 %v400_v52 }
  0xe6   :  { %1900 = vmatprep.subr.mxu0 %v382_v55  ;;  %1933 = vmatprep.subr.mxu1 %v415_v58 }
  0xe7   :  { %1901 = vmatpush3.msra.mxu0 %v366_v59  ;;  %1934 = vmatpush3.msra.mxu1 %v399_v60 }
  0xe8   :  { %1902 = vmatprep.subr.mxu0 %v381_v61  ;;  %1935 = vmatprep.subr.mxu1 %v414_v0 }
  0xe9   :  { %1903 = vmatpush3.msra.mxu0 %v365_v1  ;;  %1328 = vmatprep.mubr.f32.mxu0 %v655_v2 }
  0xea   :  { %1936 = vmatpush3.msra.mxu1 %v398_v3  ;;  %1329 = vmatmul.mubr.f32.vlgmr.msra.gmra.mxu0 %v654_v4 }
  0xeb   :  { %1937 = vmatprep.subr.mxu1 %v413_v7  ;;  %1404 = vmatprep.subr.mxu0 %v2179_v13 }
  0xec   :  { %1938 = vmatpush3.msra.mxu1 %v397_v8  ;;  %1398 = vmatprep.mubr.f32.mxu1 %v657_v9 }
  0xed   :  { %1405 = vmatpush1.msra.mxu0 %v444_v10  ;;  %1399 = vmatmul.mubr.f32.vlgmr.msra.gmra.mxu1 %v656_v11 }
  0xee   :  { %1406 = vmatprep.subr.mxu0 %v2179_v13  ;;  %1590 = vmatprep.mubr.msk.f32.mxu0 %vm697_vm0, %v675_v12 }
  0xef   :  { %1407 = vmatpush1.msra.mxu0 %v443_v51  ;;  %1959 = vmatprep.subr.mxu1 %v2179_v13 }
  0xf0   :  { %1408 = vmatprep.subr.mxu0 %v2179_v13  ;;  %1960 = vmatpush3.msra.mxu1 %v1490_v31 }
  0xf1   :  { %1409 = vmatpush1.msra.mxu0 %v442_v14  ;;  %1961 = vmatprep.subr.mxu1 %v2179_v13 }
  0xf2   :  { %1410 = vmatprep.subr.mxu0 %v2179_v13  ;;  %1962 = vmatpush3.msra.mxu1 %v1489_v32 }
  0xf3   :  { %1411 = vmatpush1.msra.mxu0 %v441_v15  ;;  %1963 = vmatprep.subr.mxu1 %v2179_v13 }
  0xf4   :  { %1412 = vmatprep.subr.mxu0 %v2179_v13  ;;  %1964 = vmatpush3.msra.mxu1 %v1488_v33 }
  0xf5   :  { %1413 = vmatpush1.msra.mxu0 %v440_v16  ;;  %1965 = vmatprep.subr.mxu1 %v2179_v13 }
  0xf6   :  { %1414 = vmatprep.subr.mxu0 %v2179_v13  ;;  %1966 = vmatpush3.msra.mxu1 %v1487_v34 }
  0xf7   :  { %1415 = vmatpush1.msra.mxu0 %v439_v17  ;;  %1967 = vmatprep.subr.mxu1 %v2179_v13 }
  0xf8   :  { %1416 = vmatprep.subr.mxu0 %v2179_v13  ;;  %1968 = vmatpush3.msra.mxu1 %v1486_v35 }
  0xf9   :  { %1417 = vmatpush1.msra.mxu0 %v438_v18  ;;  %1969 = vmatprep.subr.mxu1 %v2179_v13 }
  0xfa   :  { %1418 = vmatprep.subr.mxu0 %v2179_v13  ;;  %1970 = vmatpush3.msra.mxu1 %v1485_v36 }
  0xfb   :  { %1419 = vmatpush1.msra.mxu0 %v437_v19  ;;  %1971 = vmatprep.subr.mxu1 %v2179_v13 }
  0xfc   :  { %1420 = vmatprep.subr.mxu0 %v2179_v13  ;;  %1972 = vmatpush3.msra.mxu1 %v1484_v37 }
  0xfd   :  { %1421 = vmatpush1.msra.mxu0 %v436_v20  ;;  %1973 = vmatprep.subr.mxu1 %v2179_v13 }
  0xfe   :  { %1422 = vmatprep.subr.mxu0 %v2179_v13  ;;  %1974 = vmatpush3.msra.mxu1 %v1483_v38 }
  0xff   :  { %1423 = vmatpush1.msra.mxu0 %v435_v21  ;;  %1975 = vmatprep.subr.mxu1 %v2179_v13 }
 0x100   :  { %1424 = vmatprep.subr.mxu0 %v2179_v13  ;;  %1976 = vmatpush3.msra.mxu1 %v1482_v39 }
 0x101   :  { %1425 = vmatpush1.msra.mxu0 %v434_v22  ;;  %1977 = vmatprep.subr.mxu1 %v2179_v13 }
 0x102   :  { %1426 = vmatprep.subr.mxu0 %v2179_v13  ;;  %1978 = vmatpush3.msra.mxu1 %v1481_v40 }
 0x103   :  { %1427 = vmatpush1.msra.mxu0 %v433_v23  ;;  %1979 = vmatprep.subr.mxu1 %v2179_v13 }
 0x104   :  { %1428 = vmatprep.subr.mxu0 %v2179_v13  ;;  %1980 = vmatpush3.msra.mxu1 %v1480_v41 }
 0x105   :  { %1429 = vmatpush1.msra.mxu0 %v432_v24  ;;  %1981 = vmatprep.subr.mxu1 %v2179_v13 }
 0x106   :  { %1430 = vmatprep.subr.mxu0 %v2179_v13  ;;  %1982 = vmatpush3.msra.mxu1 %v1479_v42 }
 0x107   :  { %1431 = vmatpush1.msra.mxu0 %v431_v25  ;;  %1983 = vmatprep.subr.mxu1 %v2179_v13 }
 0x108   :  { %1432 = vmatprep.subr.mxu0 %v2179_v13  ;;  %1984 = vmatpush3.msra.mxu1 %v1478_v43 }
 0x109   :  { %1433 = vmatpush1.msra.mxu0 %v430_v26  ;;  %1985 = vmatprep.subr.mxu1 %v2179_v13 }
 0x10a   :  { %1434 = vmatprep.subr.mxu0 %v2179_v13  ;;  %1986 = vmatpush3.msra.mxu1 %v1477_v44 }
 0x10b   :  { %1435 = vmatpush1.msra.mxu0 %v429_v27  ;;  %1987 = vmatprep.subr.mxu1 %v2179_v13 }
 0x10c   :  { %1464 = vmatprep.subr.mxu0 %v2179_v13  ;;  %1988 = vmatpush3.msra.mxu1 %v1476_v45 }
 0x10d   :  { %1589 = vmatpush2.msk.msra.mxu0 %vm700_vm1, %v446_v28  ;;  %1989 = vmatprep.subr.mxu1 %v2179_v13  ;;  %v1591_v28 = vld [vmem:[#allocation10] ss:$0 sm:$0xff] }
 0x10e   :  { %1466 = vmatprep.subr.mxu0 %v2179_v13  ;;  %1990 = vmatpush3.msra.mxu1 %v1475_v46 }
 0x10f   :  { %1467 = vmatpush2.msra.mxu0 %v445_v29  ;;  %1991 = vmatprep.mubr.msk.f32.mxu1 %vm2180_vm2, %v2179_v13 }
 0x110   :  { %1469 = vmatmul.mubr.f32.vlgmr.msra.gmra.mxu0 %v674_v30 }
 0x122   :  { %v1624_v47 = vpop.f32.mrf.mxu0 }
 0x124   :  { %v1625_v48 = vpop.f32.mrf.mxu0 }
 0x125   :  { %v1659_v49 = vpop.f32.mrf.mxu1  ;;  %v1626_v52 = vadd.f32 %v1625_v48, %v1624_v47 }
 0x127   :  { %v1660_v54 = vpop.f32.mrf.mxu1  ;;  %v771_v57 = vadd.f32 %v1626_v52, %v1588_v53 }
 0x128   :  { %v1661_v58 = vadd.f32 %v1660_v54, %v1659_v49 }
 0x12a   :  { %v841_v62 = vadd.f32 %v1661_v58, %v771_v57 }
 0x144   :  { %v1694_v50 = vpop.f32.mrf.mxu0 }
 0x146   :  { %v1695_v55 = vpop.f32.mrf.mxu0 }
 0x147   :  { %v1729_v56 = vpop.f32.mrf.mxu1  ;;  %v1696_v60 = vadd.f32 %v1695_v55, %v1694_v50 }
 0x149   :  { %v1730_v61 = vpop.f32.mrf.mxu1  ;;  %v911_v1 = vadd.f32 %v1696_v60, %v841_v62 }
 0x14a   :  { %v1731_v2 = vadd.f32 %v1730_v61, %v1729_v56 }
 0x14c   :  { %v981_v6 = vadd.f32 %v1731_v2, %v911_v1 }
 0x166   :  { %v1764_v59 = vpop.f32.mrf.mxu0 }
 0x168   :  { %v1765_v63 = vpop.f32.mrf.mxu0 }
 0x169   :  { %v1799_v0 = vpop.f32.mrf.mxu1  ;;  %v1766_v4 = vadd.f32 %v1765_v63, %v1764_v59 }
 0x16b   :  { %v1800_v5 = vpop.f32.mrf.mxu1  ;;  %v1051_v9 = vadd.f32 %v1766_v4, %v981_v6 }
 0x16c   :  { %v1801_v10 = vadd.f32 %v1800_v5, %v1799_v0 }
 0x16e   :  { %v1121_v51 = vadd.f32 %v1801_v10, %v1051_v9 }
 0x188   :  { %v1834_v3 = vpop.f32.mrf.mxu0 }
 0x18a   :  { %v1835_v7 = vpop.f32.mrf.mxu0 }
 0x18b   :  { %v1869_v8 = vpop.f32.mrf.mxu1  ;;  %v1836_v12 = vadd.f32 %v1835_v7, %v1834_v3 }
 0x18d   :  { %v1870_v13 = vpop.f32.mrf.mxu1  ;;  %v1191_v16 = vadd.f32 %v1836_v12, %v1121_v51 }
 0x18e   :  { %v1871_v17 = vadd.f32 %v1870_v13, %v1869_v8 }
 0x190   :  { %v1261_v20 = vadd.f32 %v1871_v17, %v1191_v16 }
 0x1aa   :  { %v1904_v11 = vpop.f32.mrf.mxu0 }
 0x1ac   :  { %v1905_v14 = vpop.f32.mrf.mxu0 }
 0x1ad   :  { %v1939_v15 = vpop.f32.mrf.mxu1  ;;  %v1906_v18 = vadd.f32 %v1905_v14, %v1904_v11 }
 0x1af   :  { %v1940_v19 = vpop.f32.mrf.mxu1  ;;  %v1331_v21 = vadd.f32 %v1906_v18, %v1261_v20 }
 0x1b0   :  { %v1941_v22 = vadd.f32 %v1940_v19, %v1939_v15 }
 0x1b2   :  { %v1401_v23 = vadd.f32 %v1941_v22, %v1331_v21 }
 0x1d0   :  { %v1470_v24 = vpop.f32.mrf.mxu0 }
 0x1d1   :  { %v1471_v25 = vadd.f32 %v1470_v24, %v1401_v23 }
 0x1d2   :  { %v1472_v26 = vpop.f32.mrf.mxu0 }
 0x1d3   :  { %v1474_v27 = vmax.f32 %v1471_v25, 0.0 }
 0x1d5   :  { %1992 = vmatmul.mubr.f32.vlgmr.msra.gmra.mxu1 %v1474_v27 }
 0x295   :  { %v1564_v29 = vpop.f32.mrf.mxu1 }
 0x296   :  { %v1565_v30 = vadd.f32 %v1591_v28, %v1564_v29 }
 0x297   :  { %v1993_v31 = vpop.f32.mrf.mxu1 }
 0x298   :  { %1568 = vst [vmem:[#allocation11] sm:$0xff] %v1565_v30 }
 0x299   :  { %1573 = vsyncadd [#allocation4], 96  ;;  %s2181_s2 = smov [#allocation11]  }
 0x29a   :  { %s1574_s4 = sshll.u32 %s2181_s2, 4  ;;  %s1575_s4 = int_to_ptr.vmem [resolvable:$true] %s1574_s4 }
 0x29b   :  { %s2141_s22 = scalar_lea.vmem %s1575_s4, 32  ;;  %s2145_s23 = scalar_lea.vmem %s1575_s4, 128 }
 0x29c   :  { %p2142_p11 = scmp.ne.s32.totalorder %s1575_s4, %s2141_s22  ;;  %p2146_p12 = scmp.lt.s32.totalorder %s1575_s4, %s1575_s4 }
 0x29d   :  { %p2147_p13 = scmp.lt.s32.totalorder %s2145_s23, %s2141_s22 }
 0x29f   :  { %p2148_p0 = por %p2147_p13, %p2146_p12 }
 0x2a1   :  { %p2149_p1 = pnand %p2148_p0, %p2142_p11 }
 0x2a3   :  { %2152 = shalt.err (!%p2149_p1)
}
 0x2a4   :  { %s2182_s24 = smov 32   ;;  %s2183_s25 = smov 2  }
 0x2a5   :  { %1580 = dma.vmem_to_hbm [thread:$0]  %s1575_s4, 32, %s2304_s5, [#allocation4], %s2182_s24, %s2182_s24, %s2183_s25  }
 0x2a6   :  { %2167 = dma.done.wait [#allocation4], 128  }
 0x2a7   :  { %2168 = vsyncadd [#allocation4], 4294967168 }
 0x2a8   :  { %1584 = vsyncpa [#allocation3], 1 }
 0x2a9   :  { %1585 = vsyncpa [#allocation6], 1 }
 0x2aa   :  { %1586 = vsyncpa [#allocation9], 1 }
 0x2ab   :  { %1587 = vsyncpa [#allocation4], 1 }

</bundles_post_ra>
